<compile_context>
chip_gen: v7x
topology: tpu7x:2x2x1
jax: 0.10.0
libtpu: 0.0.40
codegen_flags: <defaults>
</compile_context>

<pallas_src>
import jax
import jax.numpy as jnp
from jax.experimental import pallas as pl
from jax.experimental.pallas import tpu as pltpu


def _round_up(n, m):
    return ((n + m - 1) // m) * m


def _lstm_fc_kernel(x_ref, wih_ref, whh_ref, b_ref, wfc_ref, bfc_ref,
                    out_ref, gx_scr):
    T, Bp, Fp = x_ref.shape          # (T, Bp, Fp), all padded/static
    Hp4 = wih_ref.shape[1]           # 4 * Hp
    Hp = Hp4 // 4

    # ---- Hoisted input projection for every timestep: one big MXU call ----
    x_all = x_ref[...].reshape(T * Bp, Fp)                       # (T*Bp, Fp)
    gx = (jnp.dot(x_all, wih_ref[...],
                  preferred_element_type=jnp.float32)
          + b_ref[...])                                          # (T*Bp, 4*Hp)
    gx_scr[...] = gx.reshape(T, Bp, Hp4)

    whh = whh_ref[...]                                           # (Hp, 4*Hp)

    # ---- Serial recurrence: only h @ W_hh + gate nonlinearities per step ----
    def step(t, carry):
        h, c = carry
        gates = gx_scr[t] + jnp.dot(h, whh,
                                    preferred_element_type=jnp.float32)
        # 128-lane-aligned gate chunks: [ i | f | g | o ]
        i_g = jax.nn.sigmoid(gates[:, 0 * Hp:1 * Hp])
        f_g = jax.nn.sigmoid(gates[:, 1 * Hp:2 * Hp])
        g_g = jnp.tanh(gates[:, 2 * Hp:3 * Hp])
        o_g = jax.nn.sigmoid(gates[:, 3 * Hp:4 * Hp])
        c_new = f_g * c + i_g * g_g
        h_new = o_g * jnp.tanh(c_new)
        return (h_new, c_new)

    h0 = jnp.zeros((Bp, Hp), jnp.float32)
    c0 = jnp.zeros((Bp, Hp), jnp.float32)
    h_T, _ = jax.lax.fori_loop(0, T, step, (h0, c0), unroll=True)

    # ---- Fused FC on the last hidden state (lane-dense, unmasked store) ----
    out = (jnp.dot(h_T, wfc_ref[...], preferred_element_type=jnp.float32)
           + bfc_ref[...])
    out_ref[...] = out.astype(out_ref.dtype)


def _pad_params(params, input_size, hidden, output_size, Fp, Hp, Op):
    """Zero-pad weights so every gate occupies a 128-lane-aligned chunk."""
    w_ih, w_hh, b, w_fc, b_fc = params
    w_ih_p = jnp.zeros((Fp, 4 * Hp), jnp.float32)
    w_hh_p = jnp.zeros((Hp, 4 * Hp), jnp.float32)
    b_p = jnp.zeros((1, 4 * Hp), jnp.float32)
    for g in range(4):
        src = slice(g * hidden, (g + 1) * hidden)
        dst = slice(g * Hp, g * Hp + hidden)
        w_ih_p = w_ih_p.at[:input_size, dst].set(w_ih[:, src])
        w_hh_p = w_hh_p.at[:hidden, dst].set(w_hh[:, src])
        b_p = b_p.at[:, dst].set(b[:, src])
    w_fc_p = jnp.zeros((Hp, Op), jnp.float32).at[:hidden, :output_size].set(w_fc)
    b_fc_p = jnp.zeros((1, Op), jnp.float32).at[:, :output_size].set(b_fc)
    return w_ih_p, w_hh_p, b_p, w_fc_p, b_fc_p


def hetero_convlstm_forward(x, params):
    """x: (B, T, H, W) float32. Returns (B, H, W)."""
    B, T, H, W = x.shape
    F = H * W
    w_ih, w_hh, b, w_fc, b_fc = params
    hidden = w_hh.shape[0]
    out_size = w_fc.shape[1]
    assert out_size == H * W, "output_size must equal H*W to reshape"

    LANE, SUB = 128, 8
    Fp = _round_up(F, LANE)           # 100 -> 128
    Hp = _round_up(hidden, LANE)      # 64  -> 128 (per-gate chunk)
    Op = _round_up(out_size, LANE)    # 100 -> 128
    Bp = _round_up(max(B, SUB), SUB)  # 2   -> 8

    # Time-major, zero-padded input: (T, Bp, Fp). Tiny (32 KiB) host-side prep.
    x_tm = jnp.transpose(x.reshape(B, T, F).astype(jnp.float32), (1, 0, 2))
    x_p = jnp.zeros((T, Bp, Fp), jnp.float32).at[:, :B, :F].set(x_tm)

    w_ih_p, w_hh_p, b_p, w_fc_p, b_fc_p = _pad_params(
        params, F, hidden, out_size, Fp, Hp, Op)

    vmem_spec = pl.BlockSpec(memory_space=pltpu.MemorySpace.VMEM)

    out_p = pl.pallas_call(
        _lstm_fc_kernel,
        out_shape=jax.ShapeDtypeStruct((Bp, Op), jnp.float32),
        in_specs=[vmem_spec] * 6,
        out_specs=vmem_spec,
        scratch_shapes=[
            pltpu.VMEM((T, Bp, 4 * Hp), jnp.float32),   # staged x-gates
        ],
    )(x_p, w_ih_p, w_hh_p, b_p, w_fc_p, b_fc_p)

    # Drop zero-padding (batch rows + output lanes) and reshape to the grid.
    return out_p[:B, :out_size].reshape(B, H, W)


def init_params(key, input_size=100, hidden=64, output_size=100):
    """Deterministic parameter init mirroring nn.LSTM/nn.Linear shapes."""
    k = jax.random.split(key, 6)
    s_lstm = 1.0 / jnp.sqrt(hidden)
    s_fc = 1.0 / jnp.sqrt(hidden)
    # PyTorch: weight_ih_l0 (4H, in), weight_hh_l0 (4H, H); we store transposed.
    w_ih = jax.random.uniform(k[0], (input_size, 4 * hidden), jnp.float32,
                              -s_lstm, s_lstm)
    w_hh = jax.random.uniform(k[1], (hidden, 4 * hidden), jnp.float32,
                              -s_lstm, s_lstm)
    b_ih = jax.random.uniform(k[2], (4 * hidden,), jnp.float32, -s_lstm, s_lstm)
    b_hh = jax.random.uniform(k[3], (4 * hidden,), jnp.float32, -s_lstm, s_lstm)
    b = (b_ih + b_hh).reshape(1, 4 * hidden)
    # nn.Linear: weight (out, in) -> stored transposed (in, out)
    w_fc = jax.random.uniform(k[4], (hidden, output_size), jnp.float32,
                              -s_fc, s_fc)
    b_fc = jax.random.uniform(k[5], (output_size,), jnp.float32,
                              -s_fc, s_fc).reshape(1, output_size)
    return (w_ih, w_hh, b, w_fc, b_fc)


def reference_forward(x, params):
    """Pure-JAX reference of the same math (for sanity check)."""
    w_ih, w_hh, b, w_fc, b_fc = params
    B, T, H, W = x.shape
    hidden = w_hh.shape[0]
    xs = x.reshape(B, T, H * W)
    h = jnp.zeros((B, hidden), jnp.float32)
    c = jnp.zeros((B, hidden), jnp.float32)

    def step(carry, x_t):
        h, c = carry
        g = x_t @ w_ih + h @ w_hh + b
        i = jax.nn.sigmoid(g[:, 0 * hidden:1 * hidden])
        f = jax.nn.sigmoid(g[:, 1 * hidden:2 * hidden])
        gg = jnp.tanh(g[:, 2 * hidden:3 * hidden])
        o = jax.nn.sigmoid(g[:, 3 * hidden:4 * hidden])
        c = f * c + i * gg
        h = o * jnp.tanh(c)
        return (h, c), None

    (h, c), _ = jax.lax.scan(step, (h, c), jnp.transpose(xs, (1, 0, 2)))
    out = h @ w_fc + b_fc
    return out.reshape(B, H, W)


if __name__ == "__main__":
    B, T, H, W = 2, 8, 10, 10      # grid_size = 10 -> input_size = 100
    hidden = 64
    output_size = H * W            # 100, reshaped to (B, 10, 10)

    key = jax.random.PRNGKey(0)
    kx, kp = jax.random.split(key)
    x = jax.random.normal(kx, (B, T, H, W), dtype=jnp.float32)
    params = init_params(kp, input_size=H * W, hidden=hidden,
                         output_size=output_size)

    out = hetero_convlstm_forward(x, params)
    out = jax.block_until_ready(out)

    ref = reference_forward(x, params)
    assert out.shape == (B, H, W)
    assert jnp.allclose(out, ref, atol=1e-4, rtol=1e-4), "mismatch vs reference"

    print("KERNEL_OK")
</pallas_src>

<mosaic_0001>
module attributes {stable_mosaic.version = 11 : i64} {
  func.func @_lstm_fc_kernel(%arg0: memref<8x8x128xf32, #tpu.memory_space<vmem>>, %arg1: memref<128x512xf32, #tpu.memory_space<vmem>>, %arg2: memref<128x512xf32, #tpu.memory_space<vmem>>, %arg3: memref<1x512xf32, #tpu.memory_space<vmem>>, %arg4: memref<128x128xf32, #tpu.memory_space<vmem>>, %arg5: memref<1x128xf32, #tpu.memory_space<vmem>>, %arg6: memref<8x128xf32, #tpu.memory_space<vmem>>, %arg7: memref<8x8x512xf32, #tpu.memory_space<vmem>>) attributes {dimension_semantics = [], scalar_prefetch = 0 : i64, scratch_operands = 1 : i64, tpu.core_type = #tpu.core_type<tc>} {
    %c0 = arith.constant 0 : index
    %c0_0 = arith.constant 0 : index
    %c0_1 = arith.constant 0 : index
    %0 = vector.load %arg0[%c0, %c0_0, %c0_1] : memref<8x8x128xf32, #tpu.memory_space<vmem>>, vector<8x8x128xf32>
    %1 = vector.shape_cast %0 : vector<8x8x128xf32> to vector<64x128xf32>
    %c0_2 = arith.constant 0 : index
    %c0_3 = arith.constant 0 : index
    %2 = vector.load %arg1[%c0_2, %c0_3] : memref<128x512xf32, #tpu.memory_space<vmem>>, vector<128x512xf32>
    %cst = arith.constant dense<0.000000e+00> : vector<64x512xf32>
    %3 = tpu.matmul %1, %2, %cst {dimension_numbers = #tpu.dot_dimension_numbers<[1], [0], [0], [1], [0, 0, 1, 1], [], []>} : vector<64x128xf32>, vector<128x512xf32>, vector<64x512xf32> -> vector<64x512xf32>
    %c0_4 = arith.constant 0 : index
    %c0_5 = arith.constant 0 : index
    %4 = vector.load %arg3[%c0_4, %c0_5] : memref<1x512xf32, #tpu.memory_space<vmem>>, vector<1x512xf32>
    %5 = vector.broadcast %4 : vector<1x512xf32> to vector<64x512xf32>
    %6 = arith.addf %3, %5 : vector<64x512xf32>
    %7 = vector.shape_cast %6 : vector<64x512xf32> to vector<8x8x512xf32>
    %c0_6 = arith.constant 0 : index
    %c0_7 = arith.constant 0 : index
    %c0_8 = arith.constant 0 : index
    %8 = vector.load %arg7[%c0_6, %c0_7, %c0_8] : memref<8x8x512xf32, #tpu.memory_space<vmem>>, vector<8x8x512xf32>
    tpu.vector_store %arg7[%c0_6, %c0_7, %c0_8], %7 {strides = array<i32>} : memref<8x8x512xf32, #tpu.memory_space<vmem>>, vector<8x8x512xf32>,
    %c0_9 = arith.constant 0 : index
    %c0_10 = arith.constant 0 : index
    %9 = vector.load %arg2[%c0_9, %c0_10] : memref<128x512xf32, #tpu.memory_space<vmem>>, vector<128x512xf32>
    %cst_11 = arith.constant 0.000000e+00 : f32
    %10 = vector.broadcast %cst_11 : f32 to vector<8x128xf32>
    %cst_12 = arith.constant 0.000000e+00 : f32
    %11 = vector.broadcast %cst_12 : f32 to vector<8x128xf32>
    %c0_i32 = arith.constant 0 : i32
    %12 = arith.index_cast %c0_i32 : i32 to index
    %c0_13 = arith.constant 0 : index
    %c0_14 = arith.constant 0 : index
    %13 = vector.load %arg7[%12, %c0_13, %c0_14] : memref<8x8x512xf32, #tpu.memory_space<vmem>>, vector<1x8x512xf32>
    %14 = vector.shape_cast %13 : vector<1x8x512xf32> to vector<8x512xf32>
    %cst_15 = arith.constant dense<0.000000e+00> : vector<8x512xf32>
    %15 = tpu.matmul %10, %9, %cst_15 {dimension_numbers = #tpu.dot_dimension_numbers<[1], [0], [0], [1], [0, 0, 1, 1], [], []>} : vector<8x128xf32>, vector<128x512xf32>, vector<8x512xf32> -> vector<8x512xf32>
    %16 = arith.addf %14, %15 : vector<8x512xf32>
    %17 = vector.extract_strided_slice %16 {offsets = [0, 0], sizes = [8, 128], strides = [1, 1]} : vector<8x512xf32> to vector<8x128xf32>
    %18 = arith.negf %17 : vector<8x128xf32>
    %19 = math.exp %18 : vector<8x128xf32>
    %cst_16 = arith.constant 1.000000e+00 : f32
    %20 = vector.broadcast %cst_16 : f32 to vector<8x128xf32>
    %21 = arith.addf %20, %19 : vector<8x128xf32>
    %22 = arith.divf %20, %21 : vector<8x128xf32>
    %23 = vector.extract_strided_slice %16 {offsets = [0, 128], sizes = [8, 128], strides = [1, 1]} : vector<8x512xf32> to vector<8x128xf32>
    %24 = arith.negf %23 : vector<8x128xf32>
    %25 = math.exp %24 : vector<8x128xf32>
    %cst_17 = arith.constant 1.000000e+00 : f32
    %26 = vector.broadcast %cst_17 : f32 to vector<8x128xf32>
    %27 = arith.addf %26, %25 : vector<8x128xf32>
    %28 = arith.divf %26, %27 : vector<8x128xf32>
    %29 = vector.extract_strided_slice %16 {offsets = [0, 256], sizes = [8, 128], strides = [1, 1]} : vector<8x512xf32> to vector<8x128xf32>
    %30 = math.tanh %29 : vector<8x128xf32>
    %31 = vector.extract_strided_slice %16 {offsets = [0, 384], sizes = [8, 128], strides = [1, 1]} : vector<8x512xf32> to vector<8x128xf32>
    %32 = arith.negf %31 : vector<8x128xf32>
    %33 = math.exp %32 : vector<8x128xf32>
    %cst_18 = arith.constant 1.000000e+00 : f32
    %34 = vector.broadcast %cst_18 : f32 to vector<8x128xf32>
    %35 = arith.addf %34, %33 : vector<8x128xf32>
    %36 = arith.divf %34, %35 : vector<8x128xf32>
    %37 = arith.mulf %28, %11 : vector<8x128xf32>
    %38 = arith.mulf %22, %30 : vector<8x128xf32>
    %39 = arith.addf %37, %38 : vector<8x128xf32>
    %40 = math.tanh %39 : vector<8x128xf32>
    %41 = arith.mulf %36, %40 : vector<8x128xf32>
    %c1_i32 = arith.constant 1 : i32
    %42 = arith.index_cast %c1_i32 : i32 to index
    %c0_19 = arith.constant 0 : index
    %c0_20 = arith.constant 0 : index
    %43 = vector.load %arg7[%42, %c0_19, %c0_20] : memref<8x8x512xf32, #tpu.memory_space<vmem>>, vector<1x8x512xf32>
    %44 = vector.shape_cast %43 : vector<1x8x512xf32> to vector<8x512xf32>
    %cst_21 = arith.constant dense<0.000000e+00> : vector<8x512xf32>
    %45 = tpu.matmul %41, %9, %cst_21 {dimension_numbers = #tpu.dot_dimension_numbers<[1], [0], [0], [1], [0, 0, 1, 1], [], []>} : vector<8x128xf32>, vector<128x512xf32>, vector<8x512xf32> -> vector<8x512xf32>
    %46 = arith.addf %44, %45 : vector<8x512xf32>
    %47 = vector.extract_strided_slice %46 {offsets = [0, 0], sizes = [8, 128], strides = [1, 1]} : vector<8x512xf32> to vector<8x128xf32>
    %48 = arith.negf %47 : vector<8x128xf32>
    %49 = math.exp %48 : vector<8x128xf32>
    %cst_22 = arith.constant 1.000000e+00 : f32
    %50 = vector.broadcast %cst_22 : f32 to vector<8x128xf32>
    %51 = arith.addf %50, %49 : vector<8x128xf32>
    %52 = arith.divf %50, %51 : vector<8x128xf32>
    %53 = vector.extract_strided_slice %46 {offsets = [0, 128], sizes = [8, 128], strides = [1, 1]} : vector<8x512xf32> to vector<8x128xf32>
    %54 = arith.negf %53 : vector<8x128xf32>
    %55 = math.exp %54 : vector<8x128xf32>
    %cst_23 = arith.constant 1.000000e+00 : f32
    %56 = vector.broadcast %cst_23 : f32 to vector<8x128xf32>
    %57 = arith.addf %56, %55 : vector<8x128xf32>
    %58 = arith.divf %56, %57 : vector<8x128xf32>
    %59 = vector.extract_strided_slice %46 {offsets = [0, 256], sizes = [8, 128], strides = [1, 1]} : vector<8x512xf32> to vector<8x128xf32>
    %60 = math.tanh %59 : vector<8x128xf32>
    %61 = vector.extract_strided_slice %46 {offsets = [0, 384], sizes = [8, 128], strides = [1, 1]} : vector<8x512xf32> to vector<8x128xf32>
    %62 = arith.negf %61 : vector<8x128xf32>
    %63 = math.exp %62 : vector<8x128xf32>
    %cst_24 = arith.constant 1.000000e+00 : f32
    %64 = vector.broadcast %cst_24 : f32 to vector<8x128xf32>
    %65 = arith.addf %64, %63 : vector<8x128xf32>
    %66 = arith.divf %64, %65 : vector<8x128xf32>
    %67 = arith.mulf %58, %39 : vector<8x128xf32>
    %68 = arith.mulf %52, %60 : vector<8x128xf32>
    %69 = arith.addf %67, %68 : vector<8x128xf32>
    %70 = math.tanh %69 : vector<8x128xf32>
    %71 = arith.mulf %66, %70 : vector<8x128xf32>
    %c2_i32 = arith.constant 2 : i32
    %72 = arith.index_cast %c2_i32 : i32 to index
    %c0_25 = arith.constant 0 : index
    %c0_26 = arith.constant 0 : index
    %73 = vector.load %arg7[%72, %c0_25, %c0_26] : memref<8x8x512xf32, #tpu.memory_space<vmem>>, vector<1x8x512xf32>
    %74 = vector.shape_cast %73 : vector<1x8x512xf32> to vector<8x512xf32>
    %cst_27 = arith.constant dense<0.000000e+00> : vector<8x512xf32>
    %75 = tpu.matmul %71, %9, %cst_27 {dimension_numbers = #tpu.dot_dimension_numbers<[1], [0], [0], [1], [0, 0, 1, 1], [], []>} : vector<8x128xf32>, vector<128x512xf32>, vector<8x512xf32> -> vector<8x512xf32>
    %76 = arith.addf %74, %75 : vector<8x512xf32>
    %77 = vector.extract_strided_slice %76 {offsets = [0, 0], sizes = [8, 128], strides = [1, 1]} : vector<8x512xf32> to vector<8x128xf32>
    %78 = arith.negf %77 : vector<8x128xf32>
    %79 = math.exp %78 : vector<8x128xf32>
    %cst_28 = arith.constant 1.000000e+00 : f32
    %80 = vector.broadcast %cst_28 : f32 to vector<8x128xf32>
    %81 = arith.addf %80, %79 : vector<8x128xf32>
    %82 = arith.divf %80, %81 : vector<8x128xf32>
    %83 = vector.extract_strided_slice %76 {offsets = [0, 128], sizes = [8, 128], strides = [1, 1]} : vector<8x512xf32> to vector<8x128xf32>
    %84 = arith.negf %83 : vector<8x128xf32>
    %85 = math.exp %84 : vector<8x128xf32>
    %cst_29 = arith.constant 1.000000e+00 : f32
    %86 = vector.broadcast %cst_29 : f32 to vector<8x128xf32>
    %87 = arith.addf %86, %85 : vector<8x128xf32>
    %88 = arith.divf %86, %87 : vector<8x128xf32>
    %89 = vector.extract_strided_slice %76 {offsets = [0, 256], sizes = [8, 128], strides = [1, 1]} : vector<8x512xf32> to vector<8x128xf32>
    %90 = math.tanh %89 : vector<8x128xf32>
    %91 = vector.extract_strided_slice %76 {offsets = [0, 384], sizes = [8, 128], strides = [1, 1]} : vector<8x512xf32> to vector<8x128xf32>
    %92 = arith.negf %91 : vector<8x128xf32>
    %93 = math.exp %92 : vector<8x128xf32>
    %cst_30 = arith.constant 1.000000e+00 : f32
    %94 = vector.broadcast %cst_30 : f32 to vector<8x128xf32>
    %95 = arith.addf %94, %93 : vector<8x128xf32>
    %96 = arith.divf %94, %95 : vector<8x128xf32>
    %97 = arith.mulf %88, %69 : vector<8x128xf32>
    %98 = arith.mulf %82, %90 : vector<8x128xf32>
    %99 = arith.addf %97, %98 : vector<8x128xf32>
    %100 = math.tanh %99 : vector<8x128xf32>
    %101 = arith.mulf %96, %100 : vector<8x128xf32>
    %c3_i32 = arith.constant 3 : i32
    %102 = arith.index_cast %c3_i32 : i32 to index
    %c0_31 = arith.constant 0 : index
    %c0_32 = arith.constant 0 : index
    %103 = vector.load %arg7[%102, %c0_31, %c0_32] : memref<8x8x512xf32, #tpu.memory_space<vmem>>, vector<1x8x512xf32>
    %104 = vector.shape_cast %103 : vector<1x8x512xf32> to vector<8x512xf32>
    %cst_33 = arith.constant dense<0.000000e+00> : vector<8x512xf32>
    %105 = tpu.matmul %101, %9, %cst_33 {dimension_numbers = #tpu.dot_dimension_numbers<[1], [0], [0], [1], [0, 0, 1, 1], [], []>} : vector<8x128xf32>, vector<128x512xf32>, vector<8x512xf32> -> vector<8x512xf32>
    %106 = arith.addf %104, %105 : vector<8x512xf32>
    %107 = vector.extract_strided_slice %106 {offsets = [0, 0], sizes = [8, 128], strides = [1, 1]} : vector<8x512xf32> to vector<8x128xf32>
    %108 = arith.negf %107 : vector<8x128xf32>
    %109 = math.exp %108 : vector<8x128xf32>
    %cst_34 = arith.constant 1.000000e+00 : f32
    %110 = vector.broadcast %cst_34 : f32 to vector<8x128xf32>
    %111 = arith.addf %110, %109 : vector<8x128xf32>
    %112 = arith.divf %110, %111 : vector<8x128xf32>
    %113 = vector.extract_strided_slice %106 {offsets = [0, 128], sizes = [8, 128], strides = [1, 1]} : vector<8x512xf32> to vector<8x128xf32>
    %114 = arith.negf %113 : vector<8x128xf32>
    %115 = math.exp %114 : vector<8x128xf32>
    %cst_35 = arith.constant 1.000000e+00 : f32
    %116 = vector.broadcast %cst_35 : f32 to vector<8x128xf32>
    %117 = arith.addf %116, %115 : vector<8x128xf32>
    %118 = arith.divf %116, %117 : vector<8x128xf32>
    %119 = vector.extract_strided_slice %106 {offsets = [0, 256], sizes = [8, 128], strides = [1, 1]} : vector<8x512xf32> to vector<8x128xf32>
    %120 = math.tanh %119 : vector<8x128xf32>
    %121 = vector.extract_strided_slice %106 {offsets = [0, 384], sizes = [8, 128], strides = [1, 1]} : vector<8x512xf32> to vector<8x128xf32>
    %122 = arith.negf %121 : vector<8x128xf32>
    %123 = math.exp %122 : vector<8x128xf32>
    %cst_36 = arith.constant 1.000000e+00 : f32
    %124 = vector.broadcast %cst_36 : f32 to vector<8x128xf32>
    %125 = arith.addf %124, %123 : vector<8x128xf32>
    %126 = arith.divf %124, %125 : vector<8x128xf32>
    %127 = arith.mulf %118, %99 : vector<8x128xf32>
    %128 = arith.mulf %112, %120 : vector<8x128xf32>
    %129 = arith.addf %127, %128 : vector<8x128xf32>
    %130 = math.tanh %129 : vector<8x128xf32>
    %131 = arith.mulf %126, %130 : vector<8x128xf32>
    %c4_i32 = arith.constant 4 : i32
    %132 = arith.index_cast %c4_i32 : i32 to index
    %c0_37 = arith.constant 0 : index
    %c0_38 = arith.constant 0 : index
    %133 = vector.load %arg7[%132, %c0_37, %c0_38] : memref<8x8x512xf32, #tpu.memory_space<vmem>>, vector<1x8x512xf32>
    %134 = vector.shape_cast %133 : vector<1x8x512xf32> to vector<8x512xf32>
    %cst_39 = arith.constant dense<0.000000e+00> : vector<8x512xf32>
    %135 = tpu.matmul %131, %9, %cst_39 {dimension_numbers = #tpu.dot_dimension_numbers<[1], [0], [0], [1], [0, 0, 1, 1], [], []>} : vector<8x128xf32>, vector<128x512xf32>, vector<8x512xf32> -> vector<8x512xf32>
    %136 = arith.addf %134, %135 : vector<8x512xf32>
    %137 = vector.extract_strided_slice %136 {offsets = [0, 0], sizes = [8, 128], strides = [1, 1]} : vector<8x512xf32> to vector<8x128xf32>
    %138 = arith.negf %137 : vector<8x128xf32>
    %139 = math.exp %138 : vector<8x128xf32>
    %cst_40 = arith.constant 1.000000e+00 : f32
    %140 = vector.broadcast %cst_40 : f32 to vector<8x128xf32>
    %141 = arith.addf %140, %139 : vector<8x128xf32>
    %142 = arith.divf %140, %141 : vector<8x128xf32>
    %143 = vector.extract_strided_slice %136 {offsets = [0, 128], sizes = [8, 128], strides = [1, 1]} : vector<8x512xf32> to vector<8x128xf32>
    %144 = arith.negf %143 : vector<8x128xf32>
    %145 = math.exp %144 : vector<8x128xf32>
    %cst_41 = arith.constant 1.000000e+00 : f32
    %146 = vector.broadcast %cst_41 : f32 to vector<8x128xf32>
    %147 = arith.addf %146, %145 : vector<8x128xf32>
    %148 = arith.divf %146, %147 : vector<8x128xf32>
    %149 = vector.extract_strided_slice %136 {offsets = [0, 256], sizes = [8, 128], strides = [1, 1]} : vector<8x512xf32> to vector<8x128xf32>
    %150 = math.tanh %149 : vector<8x128xf32>
    %151 = vector.extract_strided_slice %136 {offsets = [0, 384], sizes = [8, 128], strides = [1, 1]} : vector<8x512xf32> to vector<8x128xf32>
    %152 = arith.negf %151 : vector<8x128xf32>
    %153 = math.exp %152 : vector<8x128xf32>
    %cst_42 = arith.constant 1.000000e+00 : f32
    %154 = vector.broadcast %cst_42 : f32 to vector<8x128xf32>
    %155 = arith.addf %154, %153 : vector<8x128xf32>
    %156 = arith.divf %154, %155 : vector<8x128xf32>
    %157 = arith.mulf %148, %129 : vector<8x128xf32>
    %158 = arith.mulf %142, %150 : vector<8x128xf32>
    %159 = arith.addf %157, %158 : vector<8x128xf32>
    %160 = math.tanh %159 : vector<8x128xf32>
    %161 = arith.mulf %156, %160 : vector<8x128xf32>
    %c5_i32 = arith.constant 5 : i32
    %162 = arith.index_cast %c5_i32 : i32 to index
    %c0_43 = arith.constant 0 : index
    %c0_44 = arith.constant 0 : index
    %163 = vector.load %arg7[%162, %c0_43, %c0_44] : memref<8x8x512xf32, #tpu.memory_space<vmem>>, vector<1x8x512xf32>
    %164 = vector.shape_cast %163 : vector<1x8x512xf32> to vector<8x512xf32>
    %cst_45 = arith.constant dense<0.000000e+00> : vector<8x512xf32>
    %165 = tpu.matmul %161, %9, %cst_45 {dimension_numbers = #tpu.dot_dimension_numbers<[1], [0], [0], [1], [0, 0, 1, 1], [], []>} : vector<8x128xf32>, vector<128x512xf32>, vector<8x512xf32> -> vector<8x512xf32>
    %166 = arith.addf %164, %165 : vector<8x512xf32>
    %167 = vector.extract_strided_slice %166 {offsets = [0, 0], sizes = [8, 128], strides = [1, 1]} : vector<8x512xf32> to vector<8x128xf32>
    %168 = arith.negf %167 : vector<8x128xf32>
    %169 = math.exp %168 : vector<8x128xf32>
    %cst_46 = arith.constant 1.000000e+00 : f32
    %170 = vector.broadcast %cst_46 : f32 to vector<8x128xf32>
    %171 = arith.addf %170, %169 : vector<8x128xf32>
    %172 = arith.divf %170, %171 : vector<8x128xf32>
    %173 = vector.extract_strided_slice %166 {offsets = [0, 128], sizes = [8, 128], strides = [1, 1]} : vector<8x512xf32> to vector<8x128xf32>
    %174 = arith.negf %173 : vector<8x128xf32>
    %175 = math.exp %174 : vector<8x128xf32>
    %cst_47 = arith.constant 1.000000e+00 : f32
    %176 = vector.broadcast %cst_47 : f32 to vector<8x128xf32>
    %177 = arith.addf %176, %175 : vector<8x128xf32>
    %178 = arith.divf %176, %177 : vector<8x128xf32>
    %179 = vector.extract_strided_slice %166 {offsets = [0, 256], sizes = [8, 128], strides = [1, 1]} : vector<8x512xf32> to vector<8x128xf32>
    %180 = math.tanh %179 : vector<8x128xf32>
    %181 = vector.extract_strided_slice %166 {offsets = [0, 384], sizes = [8, 128], strides = [1, 1]} : vector<8x512xf32> to vector<8x128xf32>
    %182 = arith.negf %181 : vector<8x128xf32>
    %183 = math.exp %182 : vector<8x128xf32>
    %cst_48 = arith.constant 1.000000e+00 : f32
    %184 = vector.broadcast %cst_48 : f32 to vector<8x128xf32>
    %185 = arith.addf %184, %183 : vector<8x128xf32>
    %186 = arith.divf %184, %185 : vector<8x128xf32>
    %187 = arith.mulf %178, %159 : vector<8x128xf32>
    %188 = arith.mulf %172, %180 : vector<8x128xf32>
    %189 = arith.addf %187, %188 : vector<8x128xf32>
    %190 = math.tanh %189 : vector<8x128xf32>
    %191 = arith.mulf %186, %190 : vector<8x128xf32>
    %c6_i32 = arith.constant 6 : i32
    %192 = arith.index_cast %c6_i32 : i32 to index
    %c0_49 = arith.constant 0 : index
    %c0_50 = arith.constant 0 : index
    %193 = vector.load %arg7[%192, %c0_49, %c0_50] : memref<8x8x512xf32, #tpu.memory_space<vmem>>, vector<1x8x512xf32>
    %194 = vector.shape_cast %193 : vector<1x8x512xf32> to vector<8x512xf32>
    %cst_51 = arith.constant dense<0.000000e+00> : vector<8x512xf32>
    %195 = tpu.matmul %191, %9, %cst_51 {dimension_numbers = #tpu.dot_dimension_numbers<[1], [0], [0], [1], [0, 0, 1, 1], [], []>} : vector<8x128xf32>, vector<128x512xf32>, vector<8x512xf32> -> vector<8x512xf32>
    %196 = arith.addf %194, %195 : vector<8x512xf32>
    %197 = vector.extract_strided_slice %196 {offsets = [0, 0], sizes = [8, 128], strides = [1, 1]} : vector<8x512xf32> to vector<8x128xf32>
    %198 = arith.negf %197 : vector<8x128xf32>
    %199 = math.exp %198 : vector<8x128xf32>
    %cst_52 = arith.constant 1.000000e+00 : f32
    %200 = vector.broadcast %cst_52 : f32 to vector<8x128xf32>
    %201 = arith.addf %200, %199 : vector<8x128xf32>
    %202 = arith.divf %200, %201 : vector<8x128xf32>
    %203 = vector.extract_strided_slice %196 {offsets = [0, 128], sizes = [8, 128], strides = [1, 1]} : vector<8x512xf32> to vector<8x128xf32>
    %204 = arith.negf %203 : vector<8x128xf32>
    %205 = math.exp %204 : vector<8x128xf32>
    %cst_53 = arith.constant 1.000000e+00 : f32
    %206 = vector.broadcast %cst_53 : f32 to vector<8x128xf32>
    %207 = arith.addf %206, %205 : vector<8x128xf32>
    %208 = arith.divf %206, %207 : vector<8x128xf32>
    %209 = vector.extract_strided_slice %196 {offsets = [0, 256], sizes = [8, 128], strides = [1, 1]} : vector<8x512xf32> to vector<8x128xf32>
    %210 = math.tanh %209 : vector<8x128xf32>
    %211 = vector.extract_strided_slice %196 {offsets = [0, 384], sizes = [8, 128], strides = [1, 1]} : vector<8x512xf32> to vector<8x128xf32>
    %212 = arith.negf %211 : vector<8x128xf32>
    %213 = math.exp %212 : vector<8x128xf32>
    %cst_54 = arith.constant 1.000000e+00 : f32
    %214 = vector.broadcast %cst_54 : f32 to vector<8x128xf32>
    %215 = arith.addf %214, %213 : vector<8x128xf32>
    %216 = arith.divf %214, %215 : vector<8x128xf32>
    %217 = arith.mulf %208, %189 : vector<8x128xf32>
    %218 = arith.mulf %202, %210 : vector<8x128xf32>
    %219 = arith.addf %217, %218 : vector<8x128xf32>
    %220 = math.tanh %219 : vector<8x128xf32>
    %221 = arith.mulf %216, %220 : vector<8x128xf32>
    %c7_i32 = arith.constant 7 : i32
    %222 = arith.index_cast %c7_i32 : i32 to index
    %c0_55 = arith.constant 0 : index
    %c0_56 = arith.constant 0 : index
    %223 = vector.load %arg7[%222, %c0_55, %c0_56] : memref<8x8x512xf32, #tpu.memory_space<vmem>>, vector<1x8x512xf32>
    %224 = vector.shape_cast %223 : vector<1x8x512xf32> to vector<8x512xf32>
    %cst_57 = arith.constant dense<0.000000e+00> : vector<8x512xf32>
    %225 = tpu.matmul %221, %9, %cst_57 {dimension_numbers = #tpu.dot_dimension_numbers<[1], [0], [0], [1], [0, 0, 1, 1], [], []>} : vector<8x128xf32>, vector<128x512xf32>, vector<8x512xf32> -> vector<8x512xf32>
    %226 = arith.addf %224, %225 : vector<8x512xf32>
    %227 = vector.extract_strided_slice %226 {offsets = [0, 0], sizes = [8, 128], strides = [1, 1]} : vector<8x512xf32> to vector<8x128xf32>
    %228 = arith.negf %227 : vector<8x128xf32>
    %229 = math.exp %228 : vector<8x128xf32>
    %cst_58 = arith.constant 1.000000e+00 : f32
    %230 = vector.broadcast %cst_58 : f32 to vector<8x128xf32>
    %231 = arith.addf %230, %229 : vector<8x128xf32>
    %232 = arith.divf %230, %231 : vector<8x128xf32>
    %233 = vector.extract_strided_slice %226 {offsets = [0, 128], sizes = [8, 128], strides = [1, 1]} : vector<8x512xf32> to vector<8x128xf32>
    %234 = arith.negf %233 : vector<8x128xf32>
    %235 = math.exp %234 : vector<8x128xf32>
    %cst_59 = arith.constant 1.000000e+00 : f32
    %236 = vector.broadcast %cst_59 : f32 to vector<8x128xf32>
    %237 = arith.addf %236, %235 : vector<8x128xf32>
    %238 = arith.divf %236, %237 : vector<8x128xf32>
    %239 = vector.extract_strided_slice %226 {offsets = [0, 256], sizes = [8, 128], strides = [1, 1]} : vector<8x512xf32> to vector<8x128xf32>
    %240 = math.tanh %239 : vector<8x128xf32>
    %241 = vector.extract_strided_slice %226 {offsets = [0, 384], sizes = [8, 128], strides = [1, 1]} : vector<8x512xf32> to vector<8x128xf32>
    %242 = arith.negf %241 : vector<8x128xf32>
    %243 = math.exp %242 : vector<8x128xf32>
    %cst_60 = arith.constant 1.000000e+00 : f32
    %244 = vector.broadcast %cst_60 : f32 to vector<8x128xf32>
    %245 = arith.addf %244, %243 : vector<8x128xf32>
    %246 = arith.divf %244, %245 : vector<8x128xf32>
    %247 = arith.mulf %238, %219 : vector<8x128xf32>
    %248 = arith.mulf %232, %240 : vector<8x128xf32>
    %249 = arith.addf %247, %248 : vector<8x128xf32>
    %250 = math.tanh %249 : vector<8x128xf32>
    %251 = arith.mulf %246, %250 : vector<8x128xf32>
    %c8_i32 = arith.constant 8 : i32
    %c0_61 = arith.constant 0 : index
    %c0_62 = arith.constant 0 : index
    %252 = vector.load %arg4[%c0_61, %c0_62] : memref<128x128xf32, #tpu.memory_space<vmem>>, vector<128x128xf32>
    %cst_63 = arith.constant dense<0.000000e+00> : vector<8x128xf32>
    %253 = tpu.matmul %251, %252, %cst_63 {dimension_numbers = #tpu.dot_dimension_numbers<[1], [0], [0], [1], [0, 0, 1, 1], [], []>} : vector<8x128xf32>, vector<128x128xf32>, vector<8x128xf32> -> vector<8x128xf32>
    %c0_64 = arith.constant 0 : index
    %c0_65 = arith.constant 0 : index
    %254 = vector.load %arg5[%c0_64, %c0_65] : memref<1x128xf32, #tpu.memory_space<vmem>>, vector<1x128xf32>
    %255 = vector.broadcast %254 : vector<1x128xf32> to vector<8x128xf32>
    %256 = arith.addf %253, %255 : vector<8x128xf32>
    %c0_66 = arith.constant 0 : index
    %c0_67 = arith.constant 0 : index
    %257 = vector.load %arg6[%c0_66, %c0_67] : memref<8x128xf32, #tpu.memory_space<vmem>>, vector<8x128xf32>
    tpu.vector_store %arg6[%c0_66, %c0_67], %256 {strides = array<i32>} : memref<8x128xf32, #tpu.memory_space<vmem>>, vector<8x128xf32>,
    return
  }
}

</mosaic_0001>

<bundles_post_ra>
// kernel: tpu_custom_call.1
= control target key start
LH: loop header
LB: loop body
LE: loop exit
PB: predicated region body
PF: predicated region fallthrough
CT: control target
= control target key end

     0   :  { %11 = vsyncpa [#allocation4], 0  ;;  %s3559_s0 = inlined_call_operand.hbm [shape: f32[8,8,128], index: 0, kind: input, shape index: {}]   ;;  %s3560_s1 = inlined_call_operand.hbm [shape: f32[128,512], index: 1, kind: input, shape index: {}]   ;;  %s3561_s2 = inlined_call_operand.hbm [shape: f32[128,512], index: 2, kind: input, shape index: {}]   ;;  %s3562_s3 = inlined_call_operand.vmem [shape: f32[1,512], index: 3, kind: input, shape index: {}]   ;;  %s3563_s4 = inlined_call_operand.hbm [shape: f32[128,128], index: 4, kind: input, shape index: {}]   ;;  %s3564_s5 = inlined_call_operand.vmem [shape: f32[1,128], index: 5, kind: input, shape index: {}]   ;;  %s3565_s6 = inlined_call_operand.hbm [shape: f32[8,128], index: 6, kind: output, shape index: {}]  }
   0x1   :  { %12 = vsyncpa [#allocation7], 0 }
   0x2   :  { %13 = vsyncpa [#allocation10], 0 }
   0x3   :  { %14 = vsyncpa [#allocation5], 0  ;;  %s3004_s21 = smov [#allocation6]   ;;  %s2886_s25 = scalar_lea.hbm %s3560_s1, 8192 }
   0x4   :  { %s32_s22 = sshll.u32 %s3004_s21, 4  ;;  %p2887_p0 = scmp.ne.s32.totalorder %s3560_s1, %s2886_s25  ;;  %s33_s22 = int_to_ptr.vmem [resolvable:$true] %s32_s22 }
   0x5   :  { %p2890_p1 = scmp.lt.u32.totalorder %s2886_s25, %s3560_s1 }
   0x7   :  { %p2892_p2 = pnand %p2890_p1, %p2887_p0 }
   0x9   :  { %2895 = shalt.err (!%p2892_p2)
}
   0xa   :  { %s2896_s30 = scalar_lea.vmem %s33_s22, 8192  ;;  %p2901_p4 = scmp.lt.s32.totalorder %s33_s22, %s33_s22 }
   0xb   :  { %p2897_p3 = scmp.ne.s32.totalorder %s33_s22, %s2896_s30  ;;  %p2902_p5 = scmp.lt.s32.totalorder %s2896_s30, %s2896_s30 }
   0xd   :  { %p2903_p6 = por %p2902_p5, %p2901_p4 }
   0xf   :  { %p2904_p7 = pnand %p2903_p6, %p2897_p3 }
  0x11   :  { %2907 = shalt.err (!%p2904_p7)
}
  0x12   :  { %s3005_s7 = smov 512   ;;  %s3006_s8 = smov 32  }
  0x13   :  { %38 = dma.hbm_to_vmem [thread:$0]  %s3560_s1, 8192, %s33_s22, [#allocation7], %s3005_s7, %s3005_s7, %s3006_s8  }
  0x14   :  { %s3007_s11 = smov [#allocation3]   ;;  %s2908_s15 = scalar_lea.hbm %s3559_s0, 1024 }
  0x15   :  { %s20_s12 = sshll.u32 %s3007_s11, 4  ;;  %p2909_p8 = scmp.ne.s32.totalorder %s3559_s0, %s2908_s15  ;;  %s21_s12 = int_to_ptr.vmem [resolvable:$true] %s20_s12 }
  0x16   :  { %p2912_p9 = scmp.lt.u32.totalorder %s2908_s15, %s3559_s0 }
  0x18   :  { %p2914_p10 = pnand %p2912_p9, %p2909_p8 }
  0x1a   :  { %2917 = shalt.err (!%p2914_p10)
}
  0x1b   :  { %s2918_s20 = scalar_lea.vmem %s21_s12, 1024  ;;  %p2923_p12 = scmp.lt.s32.totalorder %s21_s12, %s21_s12 }
  0x1c   :  { %p2919_p11 = scmp.ne.s32.totalorder %s21_s12, %s2918_s20  ;;  %p2924_p13 = scmp.lt.s32.totalorder %s2918_s20, %s2918_s20 }
  0x1e   :  { %p2925_p0 = por %p2924_p13, %p2923_p12 }
  0x20   :  { %p2926_p1 = pnand %p2925_p0, %p2919_p11 }
  0x22   :  { %2929 = shalt.err (!%p2926_p1)
}
  0x23   :  { %s3008_s1 = smov 128   ;;  %s3009_s21 = smov 8  }
  0x24   :  { %26 = dma.hbm_to_vmem [thread:$0]  %s3559_s0, 1024, %s21_s12, [#allocation4], %s3008_s1, %s3008_s1, %s3009_s21  }
  0x25   :  { %s3010_s24 = smov [#allocation8]   ;;  %s3011_s26 = smov [#allocation9]  }
  0x26   :  { %s44_s25 = sshll.u32 %s3010_s24, 4  ;;  %s58_s27 = sshll.u32 %s3011_s26, 4  ;;  %s45_s25 = int_to_ptr.vmem [resolvable:$true] %s44_s25  ;;  %s3081_s27 = int_to_ptr.vmem [resolvable:$true] %s58_s27 }
  0x27   :  { %s2930_s30 = scalar_lea.hbm %s3561_s2, 8192 }
  0x28   :  { %p2931_p2 = scmp.ne.s32.totalorder %s3561_s2, %s2930_s30  ;;  %p2934_p3 = scmp.lt.u32.totalorder %s2930_s30, %s3561_s2 }
  0x2a   :  { %p2936_p4 = pnand %p2934_p3, %p2931_p2 }
  0x2c   :  { %2939 = shalt.err (!%p2936_p4)
}
  0x2d   :  { %s2940_s0 = scalar_lea.vmem %s45_s25, 8192  ;;  %p2945_p6 = scmp.lt.s32.totalorder %s45_s25, %s45_s25 }
  0x2e   :  { %p2941_p5 = scmp.ne.s32.totalorder %s45_s25, %s2940_s0  ;;  %p2946_p7 = scmp.lt.s32.totalorder %s2940_s0, %s2940_s0 }
  0x30   :  { %p2947_p8 = por %p2946_p7, %p2945_p6 }
  0x32   :  { %p2948_p9 = pnand %p2947_p8, %p2941_p5 }
  0x34   :  { %2951 = shalt.err (!%p2948_p9)
}
  0x35   :  { %50 = dma.hbm_to_vmem [thread:$0]  %s3561_s2, 8192, %s45_s25, [#allocation7], %s3005_s7, %s3005_s7, %s3006_s8  }
  0x36   :  { %s2952_s17 = scalar_lea.hbm %s3563_s4, 2048 }
  0x37   :  { %p2953_p10 = scmp.ne.s32.totalorder %s3563_s4, %s2952_s17  ;;  %p2956_p11 = scmp.lt.u32.totalorder %s2952_s17, %s3563_s4 }
  0x39   :  { %p2958_p12 = pnand %p2956_p11, %p2953_p10 }
  0x3b   :  { %2961 = shalt.err (!%p2958_p12)
}
  0x3c   :  { %s2962_s23 = scalar_lea.vmem %s3081_s27, 2048  ;;  %p2967_p0 = scmp.lt.s32.totalorder %s3081_s27, %s3081_s27 }
  0x3d   :  { %p2963_p13 = scmp.ne.s32.totalorder %s3081_s27, %s2962_s23  ;;  %p2968_p1 = scmp.lt.s32.totalorder %s2962_s23, %s2962_s23 }
  0x3f   :  { %p2969_p2 = por %p2968_p1, %p2967_p0 }
  0x41   :  { %p2970_p3 = pnand %p2969_p2, %p2963_p13 }
  0x43   :  { %2973 = shalt.err (!%p2970_p3)
}
  0x44   :  { %64 = dma.hbm_to_vmem [thread:$0]  %s3563_s4, 2048, %s3081_s27, [#allocation10], %s3008_s1, %s3008_s1, %s3009_s21  }
  0x45   :  { %2996 = dma.done.wait [#allocation4], 1024  }
  0x46   :  { %2997 = vsyncadd [#allocation4], 4294966272 }
  0x47   :  { %2998 = dma.done.wait [#allocation7], 16384  }
  0x48   :  { %2999 = vsyncadd [#allocation7], 4294950912 }
  0x49   :  { %3000 = dma.done.wait [#allocation10], 2048  }
  0x4a   :  { %3001 = vsyncadd [#allocation10], 4294965248  ;;  %v3012_v0 = vmov 0.0   ;;  %v88_v1 = vld [vmem:[#allocation6 + $0x8] sm:$0xff]  ;;  %v90_v3 = vld [vmem:[#allocation6 + $0x18] sm:$0xff]  ;;  %vm3014_vm0 = vmmov 0  }
  0x4b   :  { %237 = vmatprep.mubr.f32.mxu0 %v3012_v0  ;;  %350 = vmatprep.mubr.f32.mxu1 %v3012_v0  ;;  %v92_v2 = vld [vmem:[#allocation6 + $0x28] sm:$0xff]  ;;  %v94_v5 = vld [vmem:[#allocation6 + $0x38] sm:$0xff]  ;;  %v87_v6 = vld [vmem:[#allocation6] sm:$0xff]  ;;  %s3015_s21 = smov [#allocation11]  }
  0x4c   :  { %v2082_v4 = vpack.c.bf16 %v92_v2, %v88_v1  ;;  %v91_v7 = vld [vmem:[#allocation6 + $0x20] sm:$0xff]  ;;  %v2114_v8 = vpack.c.bf16 %v94_v5, %v90_v3  ;;  %v89_v10 = vld [vmem:[#allocation6 + $0x10] sm:$0xff]  ;;  %v96_v12 = vld [vmem:[#allocation6 + $0x48] sm:$0xff]  ;;  %s1994_s24 = sshll.u32 %s3015_s21, 4  ;;  %s1995_s24 = int_to_ptr.vmem [resolvable:$true] %s1994_s24 }
  0x4d   :  { %v2084_v9 = vpack.c.bf16 %v91_v7, %v87_v6  ;;  %v93_v11 = vld [vmem:[#allocation6 + $0x30] sm:$0xff]  ;;  %v100_v14 = vld [vmem:[#allocation6 + $0x68] sm:$0xff]  ;;  %v98_v15 = vld [vmem:[#allocation6 + $0x58] sm:$0xff]  ;;  %s2974_s25 = scalar_lea.vmem %s1995_s24, 128  ;;  %p2979_p5 = scmp.lt.s32.totalorder %s1995_s24, %s1995_s24 }
  0x4e   :  { %2083 = vmatprep.subr.bf16.mxu0 %v2082_v4  ;;  %v2116_v13 = vpack.c.bf16 %v93_v11, %v89_v10  ;;  %v102_v16 = vld [vmem:[#allocation6 + $0x78] sm:$0xff]  ;;  %2115 = vmatprep.subr.bf16.mxu1 %v2114_v8  ;;  %v2086_v17 = vpack.c.bf16 %v100_v14, %v96_v12  ;;  %v95_v19 = vld [vmem:[#allocation6 + $0x40] sm:$0xff]  ;;  %v97_v21 = vld [vmem:[#allocation6 + $0x50] sm:$0xff]  ;;  %p2975_p4 = scmp.ne.s32.totalorder %s1995_s24, %s2974_s25  ;;  %p2980_p6 = scmp.lt.s32.totalorder %s2974_s25, %s2974_s25 }
  0x4f   :  { %2085 = vmatpush1.bf16.msra.mxu0 %v2084_v9  ;;  %v2118_v18 = vpack.c.bf16 %v102_v16, %v98_v15  ;;  %v99_v20 = vld [vmem:[#allocation6 + $0x60] sm:$0xff]  ;;  %v101_v23 = vld [vmem:[#allocation6 + $0x70] sm:$0xff]  ;;  %v104_v24 = vld [vmem:[#allocation6 + $0x88] sm:$0xff] }
  0x50   :  { %2117 = vmatpush1.bf16.msra.mxu1 %v2116_v13  ;;  %v2088_v22 = vpack.c.bf16 %v99_v20, %v95_v19  ;;  %v108_v25 = vld [vmem:[#allocation6 + $0xa8] sm:$0xff]  ;;  %2087 = vmatprep.subr.bf16.mxu0 %v2086_v17  ;;  %v2120_v26 = vpack.c.bf16 %v101_v23, %v97_v21  ;;  %v106_v28 = vld [vmem:[#allocation6 + $0x98] sm:$0xff]  ;;  %v103_v30 = vld [vmem:[#allocation6 + $0x80] sm:$0xff]  ;;  %p2981_p7 = por %p2980_p6, %p2979_p5 }
  0x51   :  { %2119 = vmatprep.subr.bf16.mxu1 %v2118_v18  ;;  %v2090_v27 = vpack.c.bf16 %v108_v25, %v104_v24  ;;  %v110_v29 = vld [vmem:[#allocation6 + $0xb8] sm:$0xff]  ;;  %v107_v32 = vld [vmem:[#allocation6 + $0xa0] sm:$0xff]  ;;  %v105_v33 = vld [vmem:[#allocation6 + $0x90] sm:$0xff] }
  0x52   :  { %v2122_v31 = vpack.c.bf16 %v110_v29, %v106_v28  ;;  %v109_v34 = vld [vmem:[#allocation6 + $0xb0] sm:$0xff]  ;;  %v2092_v35 = vpack.c.bf16 %v107_v32, %v103_v30  ;;  %v112_v36 = vld [vmem:[#allocation6 + $0xc8] sm:$0xff]  ;;  %v114_v38 = vld [vmem:[#allocation6 + $0xd8] sm:$0xff]  ;;  %p2982_p8 = pnand %p2981_p7, %p2975_p4 }
  0x53   :  { %2089 = vmatpush1.bf16.msra.mxu0 %v2088_v22  ;;  %v116_v37 = vld [vmem:[#allocation6 + $0xe8] sm:$0xff]  ;;  %v2124_v39 = vpack.c.bf16 %v109_v34, %v105_v33  ;;  %v118_v41 = vld [vmem:[#allocation6 + $0xf8] sm:$0xff]  ;;  %v111_v42 = vld [vmem:[#allocation6 + $0xc0] sm:$0xff] }
  0x54   :  { %2121 = vmatpush1.bf16.msra.mxu1 %v2120_v26  ;;  %2091 = vmatprep.subr.bf16.mxu0 %v2090_v27  ;;  %v2094_v40 = vpack.c.bf16 %v116_v37, %v112_v36  ;;  %v115_v43 = vld [vmem:[#allocation6 + $0xe0] sm:$0xff]  ;;  %v2126_v44 = vpack.c.bf16 %v118_v41, %v114_v38  ;;  %v113_v45 = vld [vmem:[#allocation6 + $0xd0] sm:$0xff]  ;;  %v120_v47 = vld [vmem:[#allocation6 + $0x108] sm:$0xff] }
  0x55   :  { %2123 = vmatprep.subr.bf16.mxu1 %v2122_v31  ;;  %v117_v46 = vld [vmem:[#allocation6 + $0xf0] sm:$0xff]  ;;  %v124_v48 = vld [vmem:[#allocation6 + $0x128] sm:$0xff]  ;;  %v122_v49 = vld [vmem:[#allocation6 + $0x118] sm:$0xff]  ;;  %v2096_v51 = vpack.c.bf16 %v115_v43, %v111_v42 }
  0x56   :  { %v126_v50 = vld [vmem:[#allocation6 + $0x138] sm:$0xff]  ;;  %v2128_v52 = vpack.c.bf16 %v117_v46, %v113_v45  ;;  %v2098_v53 = vpack.c.bf16 %v124_v48, %v120_v47  ;;  %v119_v54 = vld [vmem:[#allocation6 + $0x100] sm:$0xff]  ;;  %v121_v56 = vld [vmem:[#allocation6 + $0x110] sm:$0xff] }
  0x57   :  { %2093 = vmatpush1.bf16.msra.mxu0 %v2092_v35  ;;  %v123_v55 = vld [vmem:[#allocation6 + $0x120] sm:$0xff]  ;;  %v2130_v57 = vpack.c.bf16 %v126_v50, %v122_v49  ;;  %v125_v58 = vld [vmem:[#allocation6 + $0x130] sm:$0xff]  ;;  %v128_v59 = vld [vmem:[#allocation6 + $0x148] sm:$0xff] }
  0x58   :  { %2125 = vmatpush1.bf16.msra.mxu1 %v2124_v39  ;;  %2095 = vmatprep.subr.bf16.mxu0 %v2094_v40  ;;  %v132_v60 = vld [vmem:[#allocation6 + $0x168] sm:$0xff]  ;;  %v130_v61 = vld [vmem:[#allocation6 + $0x158] sm:$0xff]  ;;  %v2100_v63 = vpack.c.bf16 %v123_v55, %v119_v54  ;;  %v2132_v1 = vpack.c.bf16 %v125_v58, %v121_v56  ;;  %v127_v3 = vld [vmem:[#allocation6 + $0x140] sm:$0xff] }
  0x59   :  { %2127 = vmatprep.subr.bf16.mxu1 %v2126_v44  ;;  %v134_v62 = vld [vmem:[#allocation6 + $0x178] sm:$0xff]  ;;  %v2102_v2 = vpack.c.bf16 %v132_v60, %v128_v59  ;;  %v131_v4 = vld [vmem:[#allocation6 + $0x160] sm:$0xff]  ;;  %v129_v5 = vld [vmem:[#allocation6 + $0x150] sm:$0xff] }
  0x5a   :  { %v2134_v6 = vpack.c.bf16 %v134_v62, %v130_v61  ;;  %v133_v7 = vld [vmem:[#allocation6 + $0x170] sm:$0xff]  ;;  %v136_v8 = vld [vmem:[#allocation6 + $0x188] sm:$0xff]  ;;  %v138_v10 = vld [vmem:[#allocation6 + $0x198] sm:$0xff]  ;;  %v2104_v12 = vpack.c.bf16 %v131_v4, %v127_v3 }
  0x5b   :  { %2097 = vmatpush1.bf16.msra.mxu0 %v2096_v51  ;;  %v140_v9 = vld [vmem:[#allocation6 + $0x1a8] sm:$0xff]  ;;  %v142_v11 = vld [vmem:[#allocation6 + $0x1b8] sm:$0xff]  ;;  %v2136_v13 = vpack.c.bf16 %v133_v7, %v129_v5  ;;  %v135_v15 = vld [vmem:[#allocation6 + $0x180] sm:$0xff] }
  0x5c   :  { %2129 = vmatpush1.bf16.msra.mxu1 %v2128_v52  ;;  %2099 = vmatprep.subr.bf16.mxu0 %v2098_v53  ;;  %v2106_v14 = vpack.c.bf16 %v140_v9, %v136_v8  ;;  %v139_v16 = vld [vmem:[#allocation6 + $0x1a0] sm:$0xff]  ;;  %v137_v17 = vld [vmem:[#allocation6 + $0x190] sm:$0xff]  ;;  %v2138_v18 = vpack.c.bf16 %v142_v11, %v138_v10  ;;  %v144_v20 = vld [vmem:[#allocation6 + $0x1c8] sm:$0xff] }
  0x5d   :  { %2131 = vmatprep.subr.bf16.mxu1 %v2130_v57  ;;  %v141_v19 = vld [vmem:[#allocation6 + $0x1b0] sm:$0xff]  ;;  %v148_v21 = vld [vmem:[#allocation6 + $0x1e8] sm:$0xff]  ;;  %v146_v22 = vld [vmem:[#allocation6 + $0x1d8] sm:$0xff]  ;;  %v2108_v24 = vpack.c.bf16 %v139_v16, %v135_v15 }
  0x5e   :  { %v150_v23 = vld [vmem:[#allocation6 + $0x1f8] sm:$0xff]  ;;  %v2140_v25 = vpack.c.bf16 %v141_v19, %v137_v17  ;;  %v2110_v26 = vpack.c.bf16 %v148_v21, %v144_v20  ;;  %v143_v27 = vld [vmem:[#allocation6 + $0x1c0] sm:$0xff]  ;;  %v145_v29 = vld [vmem:[#allocation6 + $0x1d0] sm:$0xff] }
  0x5f   :  { %2101 = vmatpush1.bf16.msra.mxu0 %v2100_v63  ;;  %v147_v28 = vld [vmem:[#allocation6 + $0x1e0] sm:$0xff]  ;;  %v2142_v30 = vpack.c.bf16 %v150_v23, %v146_v22  ;;  %v149_v31 = vld [vmem:[#allocation6 + $0x1f0] sm:$0xff]  ;;  %v432_v32 = vld [vmem:[#allocation8 + $0x8] sm:$0xff] }
  0x60   :  { %2133 = vmatpush1.bf16.msra.mxu1 %v2132_v1  ;;  %2103 = vmatprep.subr.bf16.mxu0 %v2102_v2  ;;  %v436_v33 = vld [vmem:[#allocation8 + $0x28] sm:$0xff]  ;;  %v434_v34 = vld [vmem:[#allocation8 + $0x18] sm:$0xff]  ;;  %v2112_v36 = vpack.c.bf16 %v147_v28, %v143_v27  ;;  %v2144_v37 = vpack.c.bf16 %v149_v31, %v145_v29  ;;  %v431_v39 = vld [vmem:[#allocation8] sm:$0xff] }
  0x61   :  { %2135 = vmatprep.subr.bf16.mxu1 %v2134_v6  ;;  %v438_v35 = vld [vmem:[#allocation8 + $0x38] sm:$0xff]  ;;  %v3120_v38 = vpack.c.bf16 %v436_v33, %v432_v32  ;;  %v435_v40 = vld [vmem:[#allocation8 + $0x20] sm:$0xff]  ;;  %v433_v42 = vld [vmem:[#allocation8 + $0x10] sm:$0xff] }
  0x62   :  { %v3122_v41 = vpack.c.bf16 %v438_v35, %v434_v34  ;;  %v437_v43 = vld [vmem:[#allocation8 + $0x30] sm:$0xff]  ;;  %v440_v44 = vld [vmem:[#allocation8 + $0x48] sm:$0xff]  ;;  %v79_v46 = vld [vmem:[#allocation3] sm:$0xff]  ;;  %v3124_v47 = vpack.c.bf16 %v435_v40, %v431_v39 }
  0x63   :  { %2105 = vmatpush1.bf16.msra.mxu0 %v2104_v12  ;;  %v444_v45 = vld [vmem:[#allocation8 + $0x68] sm:$0xff]  ;;  %v442_v48 = vld [vmem:[#allocation8 + $0x58] sm:$0xff]  ;;  %v3127_v50 = vpack.c.bf16 %v437_v43, %v433_v42  ;;  %v439_v51 = vld [vmem:[#allocation8 + $0x40] sm:$0xff] }
  0x64   :  { %2137 = vmatpush1.bf16.msra.mxu1 %v2136_v13  ;;  %2107 = vmatprep.subr.bf16.mxu0 %v2106_v14  ;;  %v446_v49 = vld [vmem:[#allocation8 + $0x78] sm:$0xff]  ;;  %v443_v52 = vld [vmem:[#allocation8 + $0x60] sm:$0xff]  ;;  %v3130_v53 = vpack.c.bf16 %v444_v45, %v440_v44  ;;  %v441_v54 = vld [vmem:[#allocation8 + $0x50] sm:$0xff] }
  0x65   :  { %2139 = vmatprep.subr.bf16.mxu1 %v2138_v18  ;;  %v445_v55 = vld [vmem:[#allocation8 + $0x70] sm:$0xff]  ;;  %v3132_v56 = vpack.c.bf16 %v446_v49, %v442_v48  ;;  %v448_v57 = vld [vmem:[#allocation8 + $0x88] sm:$0xff]  ;;  %v3135_v60 = vpack.c.bf16 %v443_v52, %v439_v51  ;;  %v450_v61 = vld [vmem:[#allocation8 + $0x98] sm:$0xff] }
  0x66   :  { %v452_v58 = vld [vmem:[#allocation8 + $0xa8] sm:$0xff]  ;;  %v454_v62 = vld [vmem:[#allocation8 + $0xb8] sm:$0xff]  ;;  %v3139_v63 = vpack.c.bf16 %v445_v55, %v441_v54  ;;  %v447_v1 = vld [vmem:[#allocation8 + $0x80] sm:$0xff] }
  0x67   :  { %2109 = vmatpush1.bf16.msra.mxu0 %v2108_v24  ;;  %v80_v59 = vld [vmem:[#allocation3 + $0x8] sm:$0xff]  ;;  %v451_v2 = vld [vmem:[#allocation8 + $0xa0] sm:$0xff]  ;;  %v3143_v3 = vpack.c.bf16 %v452_v58, %v448_v57  ;;  %v449_v4 = vld [vmem:[#allocation8 + $0x90] sm:$0xff]  ;;  %v3146_v6 = vpack.c.bf16 %v454_v62, %v450_v61 }
  0x68   :  { %2141 = vmatpush1.bf16.msra.mxu1 %v2140_v25  ;;  %2111 = vmatprep.subr.bf16.mxu0 %v2110_v26  ;;  %v453_v5 = vld [vmem:[#allocation8 + $0xb0] sm:$0xff]  ;;  %v456_v7 = vld [vmem:[#allocation8 + $0xc8] sm:$0xff]  ;;  %v3149_v10 = vpack.c.bf16 %v451_v2, %v447_v1  ;;  %v458_v11 = vld [vmem:[#allocation8 + $0xd8] sm:$0xff] }
  0x69   :  { %2143 = vmatprep.subr.bf16.mxu1 %v2142_v30  ;;  %v460_v8 = vld [vmem:[#allocation8 + $0xe8] sm:$0xff]  ;;  %v81_v9 = vld [vmem:[#allocation3 + $0x10] sm:$0xff]  ;;  %v462_v12 = vld [vmem:[#allocation8 + $0xf8] sm:$0xff]  ;;  %v3153_v13 = vpack.c.bf16 %v453_v5, %v449_v4 }
  0x6a   :  { %v455_v14 = vld [vmem:[#allocation8 + $0xc0] sm:$0xff]  ;;  %v3157_v16 = vpack.c.bf16 %v460_v8, %v456_v7  ;;  %v457_v17 = vld [vmem:[#allocation8 + $0xd0] sm:$0xff]  ;;  %v3160_v19 = vpack.c.bf16 %v462_v12, %v458_v11  ;;  %v464_v20 = vld [vmem:[#allocation8 + $0x108] sm:$0xff] }
  0x6b   :  { %2113 = vmatpush1.bf16.msra.mxu0 %v2112_v36  ;;  %v459_v15 = vld [vmem:[#allocation8 + $0xe0] sm:$0xff]  ;;  %v461_v18 = vld [vmem:[#allocation8 + $0xf0] sm:$0xff]  ;;  %v468_v21 = vld [vmem:[#allocation8 + $0x128] sm:$0xff] }
  0x6c   :  { %2145 = vmatpush1.bf16.msra.mxu1 %v2144_v37  ;;  %2147 = vmatprep.subr.bf16.mxu0 %v3120_v38  ;;  %v82_v22 = vld [vmem:[#allocation3 + $0x18] sm:$0xff]  ;;  %v3163_v23 = vpack.c.bf16 %v459_v15, %v455_v14  ;;  %v3167_v26 = vpack.c.bf16 %v461_v18, %v457_v17  ;;  %v463_v27 = vld [vmem:[#allocation8 + $0x100] sm:$0xff]  ;;  %v3171_v29 = vpack.c.bf16 %v468_v21, %v464_v20  ;;  %v465_v30 = vld [vmem:[#allocation8 + $0x110] sm:$0xff] }
  0x6d   :  { %2179 = vmatprep.subr.bf16.mxu1 %v3122_v41  ;;  %v466_v24 = vld [vmem:[#allocation8 + $0x118] sm:$0xff]  ;;  %v467_v28 = vld [vmem:[#allocation8 + $0x120] sm:$0xff]  ;;  %v469_v31 = vld [vmem:[#allocation8 + $0x130] sm:$0xff] }
  0x6e   :  { %238 = vmatmul.mubr.f32.vlgmr.msra.gmra.mrb[0].mxu0 %v79_v46  ;;  %v470_v25 = vld [vmem:[#allocation8 + $0x138] sm:$0xff]  ;;  %v472_v33 = vld [vmem:[#allocation8 + $0x148] sm:$0xff]  ;;  %v83_v35 = vld [vmem:[#allocation3 + $0x20] sm:$0xff]  ;;  %v3177_v36 = vpack.c.bf16 %v467_v28, %v463_v27  ;;  %v3181_v40 = vpack.c.bf16 %v469_v31, %v465_v30  ;;  %v153_v28 = vlaneseq }
  0x6f   :  { %351 = vmatmul.mubr.f32.vlgmr.msra.gmra.mrb[0].mxu1 %v79_v46  ;;  %2149 = vmatpush1.bf16.msra.mxu0 %v3124_v47  ;;  %v3174_v32 = vpack.c.bf16 %v470_v25, %v466_v24  ;;  %v476_v34 = vld [vmem:[#allocation8 + $0x168] sm:$0xff]  ;;  %v474_v37 = vld [vmem:[#allocation8 + $0x158] sm:$0xff]  ;;  %v471_v42 = vld [vmem:[#allocation8 + $0x140] sm:$0xff] }
  0x70   :  { %2181 = vmatpush1.bf16.msra.mxu1 %v3127_v50  ;;  %243 = vmatprep.mubr.f32.mxu0 %v3012_v0  ;;  %v478_v39 = vld [vmem:[#allocation8 + $0x178] sm:$0xff]  ;;  %v475_v43 = vld [vmem:[#allocation8 + $0x160] sm:$0xff]  ;;  %v3185_v44 = vpack.c.bf16 %v476_v34, %v472_v33  ;;  %v473_v45 = vld [vmem:[#allocation8 + $0x150] sm:$0xff]  ;;  %v154_v30 = vshrl.u32 %v153_v28, 7 }
  0x71   :  { %356 = vmatprep.mubr.f32.mxu1 %v3012_v0  ;;  %2151 = vmatprep.subr.bf16.mxu0 %v3130_v53  ;;  %v477_v46 = vld [vmem:[#allocation8 + $0x170] sm:$0xff]  ;;  %v3188_v48 = vpack.c.bf16 %v478_v39, %v474_v37  ;;  %v480_v49 = vld [vmem:[#allocation8 + $0x188] sm:$0xff]  ;;  %v3191_v54 = vpack.c.bf16 %v475_v43, %v471_v42  ;;  %v482_v55 = vld [vmem:[#allocation8 + $0x198] sm:$0xff] }
  0x72   :  { %244 = vmatmul.mubr.f32.gmra.mrb[2].mxu0 %v80_v59  ;;  %2183 = vmatprep.subr.bf16.mxu1 %v3132_v56  ;;  %v484_v51 = vld [vmem:[#allocation8 + $0x1a8] sm:$0xff]  ;;  %v486_v57 = vld [vmem:[#allocation8 + $0x1b8] sm:$0xff]  ;;  %v3195_v58 = vpack.c.bf16 %v477_v46, %v473_v45  ;;  %v483_v61 = vld [vmem:[#allocation8 + $0x1a0] sm:$0xff]  ;;  %v155_v31 = vsub.s32 0, %v154_v30  ;;  %v159_v34 = vsub.s32 1, %v154_v30  ;;  %v167_v42 = vsub.s32 3, %v154_v30 }
  0x73   :  { %357 = vmatmul.mubr.f32.gmra.mrb[2].mxu1 %v80_v59  ;;  %2153 = vmatpush1.bf16.msra.mxu0 %v3135_v60  ;;  %v84_v52 = vld [vmem:[#allocation3 + $0x28] sm:$0xff]  ;;  %v479_v59 = vld [vmem:[#allocation8 + $0x180] sm:$0xff]  ;;  %v3199_v62 = vpack.c.bf16 %v484_v51, %v480_v49  ;;  %v481_v1 = vld [vmem:[#allocation8 + $0x190] sm:$0xff]  ;;  %v3202_v4 = vpack.c.bf16 %v486_v57, %v482_v55 }
  0x74   :  { %2185 = vmatpush1.bf16.msra.mxu1 %v3139_v63  ;;  %249 = vmatprep.mubr.f32.mxu0 %v3012_v0  ;;  %v485_v2 = vld [vmem:[#allocation8 + $0x1b0] sm:$0xff]  ;;  %v488_v5 = vld [vmem:[#allocation8 + $0x1c8] sm:$0xff]  ;;  %v490_v11 = vld [vmem:[#allocation8 + $0x1d8] sm:$0xff] }
  0x75   :  { %362 = vmatprep.mubr.f32.mxu1 %v3012_v0  ;;  %2155 = vmatprep.subr.bf16.mxu0 %v3143_v3  ;;  %v492_v7 = vld [vmem:[#allocation8 + $0x1e8] sm:$0xff]  ;;  %v85_v8 = vld [vmem:[#allocation3 + $0x30] sm:$0xff]  ;;  %v494_v12 = vld [vmem:[#allocation8 + $0x1f8] sm:$0xff]  ;;  %v3209_v14 = vpack.c.bf16 %v485_v2, %v481_v1 }
  0x76   :  { %250 = vmatmul.mubr.f32.gmra.mrb[4].mxu0 %v81_v9  ;;  %2187 = vmatprep.subr.bf16.mxu1 %v3146_v6  ;;  %v487_v15 = vld [vmem:[#allocation8 + $0x1c0] sm:$0xff]  ;;  %v3213_v18 = vpack.c.bf16 %v492_v7, %v488_v5  ;;  %v489_v20 = vld [vmem:[#allocation8 + $0x1d0] sm:$0xff]  ;;  %v86_v24 = vld [vmem:[#allocation3 + $0x38] sm:$0xff] }
  0x77   :  { %363 = vmatmul.mubr.f32.gmra.mrb[4].mxu1 %v81_v9  ;;  %2157 = vmatpush1.bf16.msra.mxu0 %v3149_v10  ;;  %v3205_v9 = vpack.c.bf16 %v483_v61, %v479_v59  ;;  %v491_v17 = vld [vmem:[#allocation8 + $0x1e0] sm:$0xff]  ;;  %v493_v21 = vld [vmem:[#allocation8 + $0x1f0] sm:$0xff]  ;;  %v163_v59 = vsub.s32 2, %v154_v30 }
  0x78   :  { %2189 = vmatpush1.bf16.msra.mxu1 %v3153_v13  ;;  %255 = vmatprep.mubr.f32.mxu0 %v3012_v0  ;;  %v3219_v25 = vpack.c.bf16 %v491_v17, %v487_v15  ;;  %v3223_v27 = vpack.c.bf16 %v493_v21, %v489_v20  ;;  %v151_v33 = vld [vmem:[%s3562_s3] sm:$0xf] }
  0x79   :  { %368 = vmatprep.mubr.f32.mxu1 %v3012_v0  ;;  %2159 = vmatprep.subr.bf16.mxu0 %v3157_v16  ;;  %v3275_v37 = vrot.slane %v151_v33, %v159_v34  ;;  %v3279_v57 = vrot.slane %v151_v33, %v167_v42  ;;  %v3282_v1 = vrot.slane %v151_v33, %v163_v59 }
  0x7a   :  { %256 = vmatmul.mubr.f32.gmra.mrb[6].mxu0 %v82_v22  ;;  %2191 = vmatprep.subr.bf16.mxu1 %v3160_v19 }
  0x7b   :  { %369 = vmatmul.mubr.f32.gmra.mrb[6].mxu1 %v82_v22  ;;  %2161 = vmatpush1.bf16.msra.mxu0 %v3163_v23  ;;  %v3216_v22 = vpack.c.bf16 %v494_v12, %v490_v11 }
  0x7c   :  { %2193 = vmatpush1.bf16.msra.mxu1 %v3167_v26  ;;  %261 = vmatprep.mubr.f32.mxu0 %v3012_v0 }
  0x7d   :  { %374 = vmatprep.mubr.f32.mxu1 %v3012_v0  ;;  %2163 = vmatprep.subr.bf16.mxu0 %v3171_v29 }
  0x7e   :  { %262 = vmatmul.mubr.f32.gmra.mrb[8].mxu0 %v83_v35  ;;  %2195 = vmatprep.subr.bf16.mxu1 %v3174_v32 }
  0x7f   :  { %375 = vmatmul.mubr.f32.gmra.mrb[8].mxu1 %v83_v35  ;;  %2165 = vmatpush1.bf16.msra.mxu0 %v3177_v36  ;;  %v3273_v35 = vrot.slane %v151_v33, %v155_v31 }
  0x80   :  { %2197 = vmatpush1.bf16.msra.mxu1 %v3181_v40  ;;  %267 = vmatprep.mubr.f32.mxu0 %v3012_v0 }
  0x81   :  { %380 = vmatprep.mubr.f32.mxu1 %v3012_v0  ;;  %2167 = vmatprep.subr.bf16.mxu0 %v3185_v44 }
  0x82   :  { %268 = vmatmul.mubr.f32.gmra.mrb[10].mxu0 %v84_v52  ;;  %2199 = vmatprep.subr.bf16.mxu1 %v3188_v48 }
  0x83   :  { %381 = vmatmul.mubr.f32.gmra.mrb[10].mxu1 %v84_v52  ;;  %2169 = vmatpush1.bf16.msra.mxu0 %v3191_v54 }
  0x84   :  { %2201 = vmatpush1.bf16.msra.mxu1 %v3195_v58  ;;  %273 = vmatprep.mubr.f32.mxu0 %v3012_v0 }
  0x85   :  { %386 = vmatprep.mubr.f32.mxu1 %v3012_v0  ;;  %2171 = vmatprep.subr.bf16.mxu0 %v3199_v62 }
  0x86   :  { %274 = vmatmul.mubr.f32.gmra.mrb[12].mxu0 %v85_v8  ;;  %2203 = vmatprep.subr.bf16.mxu1 %v3202_v4 }
  0x87   :  { %387 = vmatmul.mubr.f32.gmra.mrb[12].mxu1 %v85_v8  ;;  %2173 = vmatpush1.bf16.msra.mxu0 %v3205_v9 }
  0x88   :  { %2205 = vmatpush1.bf16.msra.mxu1 %v3209_v14  ;;  %279 = vmatprep.mubr.f32.mxu0 %v3012_v0 }
  0x89   :  { %392 = vmatprep.mubr.f32.mxu1 %v3012_v0  ;;  %2175 = vmatprep.subr.bf16.mxu0 %v3213_v18 }
  0x8a   :  { %280 = vmatmul.mubr.f32.gmra.mrb[14].mxu0 %v86_v24  ;;  %2207 = vmatprep.subr.bf16.mxu1 %v3216_v22 }
  0x8b   :  { %393 = vmatmul.mubr.f32.gmra.mrb[14].mxu1 %v86_v24  ;;  %2177 = vmatpush1.bf16.msra.mxu0 %v3219_v25 }
  0x8c   :  { %2209 = vmatpush1.bf16.msra.mxu1 %v3223_v27  ;;  %563 = vmatprep.mubr.f32.mxu0 %v3012_v0 }
  0x8d   :  { %634 = vmatprep.mubr.f32.mxu1 %v3012_v0  ;;  %2211 = vmatprep.subr.bf16.mxu0 %v3120_v38 }
  0x8e   :  { %564 = vmatmul.mubr.f32.vlgmr.msra.gmra.mrb[0].mxu0 %v3012_v0  ;;  %2243 = vmatprep.subr.bf16.mxu1 %v3122_v41 }
  0x8f   :  { %635 = vmatmul.mubr.f32.vlgmr.msra.gmra.mrb[0].mxu1 %v3012_v0  ;;  %2213 = vmatpush1.bf16.msra.mxu0 %v3124_v47 }
  0x90   :  { %2245 = vmatpush1.bf16.msra.mxu1 %v3127_v50  ;;  %2215 = vmatprep.subr.bf16.mxu0 %v3130_v53 }
  0x91   :  { %2247 = vmatprep.subr.bf16.mxu1 %v3132_v56  ;;  %738 = vmatprep.mubr.f32.mxu0 %v3012_v0 }
  0x92   :  { %809 = vmatprep.mubr.f32.mxu1 %v3012_v0 }
  0x93   :  { %2217 = vmatpush1.bf16.msra.mxu0 %v3135_v60 }
  0x94   :  { %2249 = vmatpush1.bf16.msra.mxu1 %v3139_v63  ;;  %2219 = vmatprep.subr.bf16.mxu0 %v3143_v3 }
  0x95   :  { %2251 = vmatprep.subr.bf16.mxu1 %v3146_v6 }
  0x97   :  { %2221 = vmatpush1.bf16.msra.mxu0 %v3149_v10 }
  0x98   :  { %2253 = vmatpush1.bf16.msra.mxu1 %v3153_v13  ;;  %2223 = vmatprep.subr.bf16.mxu0 %v3157_v16 }
  0x99   :  { %2255 = vmatprep.subr.bf16.mxu1 %v3160_v19 }
  0x9b   :  { %2225 = vmatpush1.bf16.msra.mxu0 %v3163_v23 }
  0x9c   :  { %2257 = vmatpush1.bf16.msra.mxu1 %v3167_v26  ;;  %2227 = vmatprep.subr.bf16.mxu0 %v3171_v29 }
  0x9d   :  { %2259 = vmatprep.subr.bf16.mxu1 %v3174_v32 }
  0x9f   :  { %2229 = vmatpush1.bf16.msra.mxu0 %v3177_v36 }
  0xa0   :  { %2261 = vmatpush1.bf16.msra.mxu1 %v3181_v40  ;;  %2231 = vmatprep.subr.bf16.mxu0 %v3185_v44 }
  0xa1   :  { %2263 = vmatprep.subr.bf16.mxu1 %v3188_v48 }
  0xa3   :  { %2233 = vmatpush1.bf16.msra.mxu0 %v3191_v54 }
  0xa4   :  { %2265 = vmatpush1.bf16.msra.mxu1 %v3195_v58  ;;  %2235 = vmatprep.subr.bf16.mxu0 %v3199_v62 }
  0xa5   :  { %2267 = vmatprep.subr.bf16.mxu1 %v3202_v4 }
  0xa7   :  { %2237 = vmatpush1.bf16.msra.mxu0 %v3205_v9 }
  0xa8   :  { %2269 = vmatpush1.bf16.msra.mxu1 %v3209_v14  ;;  %2239 = vmatprep.subr.bf16.mxu0 %v3213_v18 }
  0xa9   :  { %2271 = vmatprep.subr.bf16.mxu1 %v3216_v22 }
  0xab   :  { %2241 = vmatpush1.bf16.msra.mxu0 %v3219_v25 }
  0xac   :  { %2273 = vmatpush1.bf16.msra.mxu1 %v3223_v27  ;;  %2275 = vmatprep.subr.bf16.mxu0 %v3120_v38 }
  0xad   :  { %2307 = vmatprep.subr.bf16.mxu1 %v3122_v41 }
 0x161   :  { %v565_v39 = vpop.f32.mrb[0].mxu0 }
 0x162   :  { %v2682_v43 = vadd.f32 %v565_v39, %v3273_v35  ;;  %v636_v45 = vpop.f32.mrb[0].mxu1  ;;  %v567_v46 = vpop.f32.mrb[1].mxu0 }
 0x163   :  { %v2683_v49 = vadd.f32 %v567_v46, %v3275_v37  ;;  %v638_v51 = vpop.f32.mrb[1].mxu1  ;;  %v2698_v5 = vadd.f32 %v636_v45, %v3282_v1 }
 0x164   :  { %v2005_v52 = vmul.f32 -1.442695, %v2682_v43  ;;  %v2699_v61 = vadd.f32 %v638_v51, %v3279_v57 }
 0x165   :  { %v2006_v55 = vmul.f32 -1.442695, %v2683_v49 }
 0x166   :  { %2758 = vpow2.f32 %v2005_v52  ;;  %v2007_v2 = vmul.f32 -1.442695, %v2699_v61 }
 0x167   :  { %2760 = vpow2.f32 %v2006_v55 }
 0x168   :  { %2762 = vpow2.f32 %v2007_v2 }
 0x169   :  { %2764 = vtanh.f32 %v2698_v5 }
 0x170   :  { %v2759_v7 = vpop.eup %2758 }
 0x171   :  { %v2761_v8 = vpop.eup %2760  ;;  %v648_v11 = vadd.f32 1.0, %v2759_v7 }
 0x172   :  { %v654_v12 = vadd.f32 1.0, %v2761_v8  ;;  %v2763_v15 = vpop.eup %2762 }
 0x173   :  { %2766 = vrcp.f32 %v648_v11  ;;  %v2765_v17 = vpop.eup %2764  ;;  %v661_v28 = vadd.f32 1.0, %v2763_v15 }
 0x174   :  { %2768 = vrcp.f32 %v654_v12 }
 0x175   :  { %2770 = vrcp.f32 %v661_v28 }
 0x17d   :  { %v2767_v20 = vpop.eup %2766 }
 0x17e   :  { %v2769_v21 = vpop.eup %2768  ;;  %v665_v24 = vmul.f32 %v2767_v20, %v2765_v17 }
 0x17f   :  { %v664_v30 = vmul.f32 0.0, %v2769_v21  ;;  %v2771_v33 = vpop.eup %2770 }
 0x181   :  { %v3285_v31 = vadd.f32 %v665_v24, %v664_v30 }
 0x183   :  { %2772 = vtanh.f32 %v3285_v31 }
 0x18d   :  { %v2773_v34 = vpop.eup %2772 }
 0x18e   :  { %v668_v39 = vmul.f32 %v2773_v34, %v2771_v33 }
 0x190   :  { %739 = vmatmul.mubr.f32.vlgmr.msra.gmra.mrb[2].mxu0 %v668_v39  ;;  %810 = vmatmul.mubr.f32.vlgmr.msra.gmra.mrb[2].mxu1 %v668_v39 }
 0x191   :  { %2277 = vmatpush1.bf16.msra.mxu0 %v3124_v47  ;;  %2309 = vmatpush1.bf16.msra.mxu1 %v3127_v50 }
 0x192   :  { %2279 = vmatprep.subr.bf16.mxu0 %v3130_v53  ;;  %2311 = vmatprep.subr.bf16.mxu1 %v3132_v56 }
 0x193   :  { %913 = vmatprep.mubr.f32.mxu0 %v3012_v0  ;;  %984 = vmatprep.mubr.f32.mxu1 %v3012_v0 }
 0x195   :  { %2281 = vmatpush1.bf16.msra.mxu0 %v3135_v60  ;;  %2313 = vmatpush1.bf16.msra.mxu1 %v3139_v63 }
 0x196   :  { %2283 = vmatprep.subr.bf16.mxu0 %v3143_v3  ;;  %2315 = vmatprep.subr.bf16.mxu1 %v3146_v6 }
 0x199   :  { %2285 = vmatpush1.bf16.msra.mxu0 %v3149_v10  ;;  %2317 = vmatpush1.bf16.msra.mxu1 %v3153_v13 }
 0x19a   :  { %2287 = vmatprep.subr.bf16.mxu0 %v3157_v16  ;;  %2319 = vmatprep.subr.bf16.mxu1 %v3160_v19 }
 0x19d   :  { %2289 = vmatpush1.bf16.msra.mxu0 %v3163_v23  ;;  %2321 = vmatpush1.bf16.msra.mxu1 %v3167_v26 }
 0x19e   :  { %2291 = vmatprep.subr.bf16.mxu0 %v3171_v29  ;;  %2323 = vmatprep.subr.bf16.mxu1 %v3174_v32 }
 0x1a1   :  { %2293 = vmatpush1.bf16.msra.mxu0 %v3177_v36  ;;  %2325 = vmatpush1.bf16.msra.mxu1 %v3181_v40 }
 0x1a2   :  { %2295 = vmatprep.subr.bf16.mxu0 %v3185_v44  ;;  %2327 = vmatprep.subr.bf16.mxu1 %v3188_v48 }
 0x1a5   :  { %2297 = vmatpush1.bf16.msra.mxu0 %v3191_v54  ;;  %2329 = vmatpush1.bf16.msra.mxu1 %v3195_v58 }
 0x1a6   :  { %2299 = vmatprep.subr.bf16.mxu0 %v3199_v62  ;;  %2331 = vmatprep.subr.bf16.mxu1 %v3202_v4 }
 0x1a9   :  { %2301 = vmatpush1.bf16.msra.mxu0 %v3205_v9  ;;  %2333 = vmatpush1.bf16.msra.mxu1 %v3209_v14 }
 0x1aa   :  { %2303 = vmatprep.subr.bf16.mxu0 %v3213_v18  ;;  %2335 = vmatprep.subr.bf16.mxu1 %v3216_v22 }
 0x1ad   :  { %2305 = vmatpush1.bf16.msra.mxu0 %v3219_v25  ;;  %2337 = vmatpush1.bf16.msra.mxu1 %v3223_v27 }
 0x1ae   :  { %2339 = vmatprep.subr.bf16.mxu0 %v3120_v38  ;;  %2371 = vmatprep.subr.bf16.mxu1 %v3122_v41 }
 0x263   :  { %v740_v42 = vpop.f32.mrb[2].mxu0  ;;  %v811_v43 = vpop.f32.mrb[2].mxu1 }
 0x264   :  { %v2684_v45 = vadd.f32 %v740_v42, %v3273_v35  ;;  %v742_v46 = vpop.f32.mrb[3].mxu0  ;;  %v813_v49 = vpop.f32.mrb[3].mxu1  ;;  %v2700_v2 = vadd.f32 %v811_v43, %v3282_v1 }
 0x265   :  { %v2685_v51 = vadd.f32 %v742_v46, %v3275_v37  ;;  %v2701_v59 = vadd.f32 %v813_v49, %v3279_v57 }
 0x266   :  { %v2008_v52 = vmul.f32 -1.442695, %v2684_v45 }
 0x267   :  { %v2009_v55 = vmul.f32 -1.442695, %v2685_v51  ;;  %v2010_v61 = vmul.f32 -1.442695, %v2701_v59 }
 0x268   :  { %2774 = vpow2.f32 %v2008_v52 }
 0x269   :  { %2776 = vpow2.f32 %v2009_v55 }
 0x26a   :  { %2778 = vpow2.f32 %v2010_v61 }
 0x26b   :  { %2780 = vtanh.f32 %v2700_v2 }
 0x272   :  { %v2775_v5 = vpop.eup %2774 }
 0x273   :  { %v2777_v7 = vpop.eup %2776  ;;  %v823_v8 = vadd.f32 1.0, %v2775_v5 }
 0x274   :  { %v829_v11 = vadd.f32 1.0, %v2777_v7  ;;  %v2779_v12 = vpop.eup %2778 }
 0x275   :  { %2782 = vrcp.f32 %v823_v8  ;;  %v2781_v15 = vpop.eup %2780  ;;  %v836_v24 = vadd.f32 1.0, %v2779_v12 }
 0x276   :  { %2784 = vrcp.f32 %v829_v11 }
 0x277   :  { %2786 = vrcp.f32 %v836_v24 }
 0x27f   :  { %v2783_v17 = vpop.eup %2782 }
 0x280   :  { %v2785_v20 = vpop.eup %2784  ;;  %v840_v21 = vmul.f32 %v2783_v17, %v2781_v15 }
 0x281   :  { %v839_v28 = vmul.f32 %v2785_v20, %v3285_v31  ;;  %v2787_v33 = vpop.eup %2786 }
 0x283   :  { %v3327_v30 = vadd.f32 %v840_v21, %v839_v28 }
 0x285   :  { %2788 = vtanh.f32 %v3327_v30 }
 0x28f   :  { %v2789_v34 = vpop.eup %2788 }
 0x290   :  { %v843_v39 = vmul.f32 %v2789_v34, %v2787_v33 }
 0x292   :  { %914 = vmatmul.mubr.f32.vlgmr.msra.gmra.mrb[4].mxu0 %v843_v39  ;;  %985 = vmatmul.mubr.f32.vlgmr.msra.gmra.mrb[4].mxu1 %v843_v39 }
 0x293   :  { %2341 = vmatpush1.bf16.msra.mxu0 %v3124_v47  ;;  %2373 = vmatpush1.bf16.msra.mxu1 %v3127_v50 }
 0x294   :  { %2343 = vmatprep.subr.bf16.mxu0 %v3130_v53  ;;  %2375 = vmatprep.subr.bf16.mxu1 %v3132_v56 }
 0x295   :  { %1088 = vmatprep.mubr.f32.mxu0 %v3012_v0  ;;  %1159 = vmatprep.mubr.f32.mxu1 %v3012_v0 }
 0x297   :  { %2345 = vmatpush1.bf16.msra.mxu0 %v3135_v60  ;;  %2377 = vmatpush1.bf16.msra.mxu1 %v3139_v63 }
 0x298   :  { %2347 = vmatprep.subr.bf16.mxu0 %v3143_v3  ;;  %2379 = vmatprep.subr.bf16.mxu1 %v3146_v6 }
 0x29b   :  { %2349 = vmatpush1.bf16.msra.mxu0 %v3149_v10  ;;  %2381 = vmatpush1.bf16.msra.mxu1 %v3153_v13 }
 0x29c   :  { %2351 = vmatprep.subr.bf16.mxu0 %v3157_v16  ;;  %2383 = vmatprep.subr.bf16.mxu1 %v3160_v19 }
 0x29f   :  { %2353 = vmatpush1.bf16.msra.mxu0 %v3163_v23  ;;  %2385 = vmatpush1.bf16.msra.mxu1 %v3167_v26 }
 0x2a0   :  { %2355 = vmatprep.subr.bf16.mxu0 %v3171_v29  ;;  %2387 = vmatprep.subr.bf16.mxu1 %v3174_v32 }
 0x2a3   :  { %2357 = vmatpush1.bf16.msra.mxu0 %v3177_v36  ;;  %2389 = vmatpush1.bf16.msra.mxu1 %v3181_v40 }
 0x2a4   :  { %2359 = vmatprep.subr.bf16.mxu0 %v3185_v44  ;;  %2391 = vmatprep.subr.bf16.mxu1 %v3188_v48 }
 0x2a7   :  { %2361 = vmatpush1.bf16.msra.mxu0 %v3191_v54  ;;  %2393 = vmatpush1.bf16.msra.mxu1 %v3195_v58 }
 0x2a8   :  { %2363 = vmatprep.subr.bf16.mxu0 %v3199_v62  ;;  %2395 = vmatprep.subr.bf16.mxu1 %v3202_v4 }
 0x2ab   :  { %2365 = vmatpush1.bf16.msra.mxu0 %v3205_v9  ;;  %2397 = vmatpush1.bf16.msra.mxu1 %v3209_v14 }
 0x2ac   :  { %2367 = vmatprep.subr.bf16.mxu0 %v3213_v18  ;;  %2399 = vmatprep.subr.bf16.mxu1 %v3216_v22 }
 0x2af   :  { %2369 = vmatpush1.bf16.msra.mxu0 %v3219_v25  ;;  %2401 = vmatpush1.bf16.msra.mxu1 %v3223_v27 }
 0x2b0   :  { %2403 = vmatprep.subr.bf16.mxu0 %v3120_v38  ;;  %2435 = vmatprep.subr.bf16.mxu1 %v3122_v41 }
 0x365   :  { %v915_v31 = vpop.f32.mrb[4].mxu0  ;;  %v986_v42 = vpop.f32.mrb[4].mxu1 }
 0x366   :  { %v2686_v43 = vadd.f32 %v915_v31, %v3273_v35  ;;  %v917_v45 = vpop.f32.mrb[5].mxu0  ;;  %v988_v46 = vpop.f32.mrb[5].mxu1  ;;  %v2702_v61 = vadd.f32 %v986_v42, %v3282_v1 }
 0x367   :  { %v2687_v49 = vadd.f32 %v917_v45, %v3275_v37  ;;  %v2703_v55 = vadd.f32 %v988_v46, %v3279_v57 }
 0x368   :  { %v2011_v51 = vmul.f32 -1.442695, %v2686_v43 }
 0x369   :  { %v2012_v52 = vmul.f32 -1.442695, %v2687_v49  ;;  %v2013_v59 = vmul.f32 -1.442695, %v2703_v55 }
 0x36a   :  { %2790 = vpow2.f32 %v2011_v51 }
 0x36b   :  { %2792 = vpow2.f32 %v2012_v52 }
 0x36c   :  { %2794 = vpow2.f32 %v2013_v59 }
 0x36d   :  { %2796 = vtanh.f32 %v2702_v61 }
 0x374   :  { %v2791_v2 = vpop.eup %2790 }
 0x375   :  { %v2793_v5 = vpop.eup %2792  ;;  %v998_v7 = vadd.f32 1.0, %v2791_v2 }
 0x376   :  { %v1004_v8 = vadd.f32 1.0, %v2793_v5  ;;  %v2795_v11 = vpop.eup %2794 }
 0x377   :  { %2798 = vrcp.f32 %v998_v7  ;;  %v2797_v12 = vpop.eup %2796  ;;  %v1011_v21 = vadd.f32 1.0, %v2795_v11 }
 0x378   :  { %2800 = vrcp.f32 %v1004_v8 }
 0x379   :  { %2802 = vrcp.f32 %v1011_v21 }
 0x381   :  { %v2799_v15 = vpop.eup %2798 }
 0x382   :  { %v2801_v17 = vpop.eup %2800  ;;  %v1015_v20 = vmul.f32 %v2799_v15, %v2797_v12 }
 0x383   :  { %v1014_v24 = vmul.f32 %v2801_v17, %v3327_v30  ;;  %v2803_v33 = vpop.eup %2802 }
 0x385   :  { %v3369_v28 = vadd.f32 %v1015_v20, %v1014_v24 }
 0x387   :  { %2804 = vtanh.f32 %v3369_v28 }
 0x391   :  { %v2805_v34 = vpop.eup %2804 }
 0x392   :  { %v1018_v39 = vmul.f32 %v2805_v34, %v2803_v33 }
 0x394   :  { %1089 = vmatmul.mubr.f32.vlgmr.msra.gmra.mrb[6].mxu0 %v1018_v39  ;;  %1160 = vmatmul.mubr.f32.vlgmr.msra.gmra.mrb[6].mxu1 %v1018_v39 }
 0x395   :  { %2405 = vmatpush1.bf16.msra.mxu0 %v3124_v47  ;;  %2437 = vmatpush1.bf16.msra.mxu1 %v3127_v50 }
 0x396   :  { %2407 = vmatprep.subr.bf16.mxu0 %v3130_v53  ;;  %2439 = vmatprep.subr.bf16.mxu1 %v3132_v56 }
 0x397   :  { %1263 = vmatprep.mubr.f32.mxu0 %v3012_v0  ;;  %1334 = vmatprep.mubr.f32.mxu1 %v3012_v0 }
 0x399   :  { %2409 = vmatpush1.bf16.msra.mxu0 %v3135_v60  ;;  %2441 = vmatpush1.bf16.msra.mxu1 %v3139_v63 }
 0x39a   :  { %2411 = vmatprep.subr.bf16.mxu0 %v3143_v3  ;;  %2443 = vmatprep.subr.bf16.mxu1 %v3146_v6 }
 0x39d   :  { %2413 = vmatpush1.bf16.msra.mxu0 %v3149_v10  ;;  %2445 = vmatpush1.bf16.msra.mxu1 %v3153_v13 }
 0x39e   :  { %2415 = vmatprep.subr.bf16.mxu0 %v3157_v16  ;;  %2447 = vmatprep.subr.bf16.mxu1 %v3160_v19 }
 0x3a1   :  { %2417 = vmatpush1.bf16.msra.mxu0 %v3163_v23  ;;  %2449 = vmatpush1.bf16.msra.mxu1 %v3167_v26 }
 0x3a2   :  { %2419 = vmatprep.subr.bf16.mxu0 %v3171_v29  ;;  %2451 = vmatprep.subr.bf16.mxu1 %v3174_v32 }
 0x3a5   :  { %2421 = vmatpush1.bf16.msra.mxu0 %v3177_v36  ;;  %2453 = vmatpush1.bf16.msra.mxu1 %v3181_v40 }
 0x3a6   :  { %2423 = vmatprep.subr.bf16.mxu0 %v3185_v44  ;;  %2455 = vmatprep.subr.bf16.mxu1 %v3188_v48 }
 0x3a9   :  { %2425 = vmatpush1.bf16.msra.mxu0 %v3191_v54  ;;  %2457 = vmatpush1.bf16.msra.mxu1 %v3195_v58 }
 0x3aa   :  { %2427 = vmatprep.subr.bf16.mxu0 %v3199_v62  ;;  %2459 = vmatprep.subr.bf16.mxu1 %v3202_v4 }
 0x3ad   :  { %2429 = vmatpush1.bf16.msra.mxu0 %v3205_v9  ;;  %2461 = vmatpush1.bf16.msra.mxu1 %v3209_v14 }
 0x3ae   :  { %2431 = vmatprep.subr.bf16.mxu0 %v3213_v18  ;;  %2463 = vmatprep.subr.bf16.mxu1 %v3216_v22 }
 0x3b1   :  { %2433 = vmatpush1.bf16.msra.mxu0 %v3219_v25  ;;  %2465 = vmatpush1.bf16.msra.mxu1 %v3223_v27 }
 0x3b2   :  { %2467 = vmatprep.subr.bf16.mxu0 %v3120_v38  ;;  %2499 = vmatprep.subr.bf16.mxu1 %v3122_v41 }
 0x467   :  { %v1090_v30 = vpop.f32.mrb[6].mxu0  ;;  %v1161_v31 = vpop.f32.mrb[6].mxu1 }
 0x468   :  { %v2688_v42 = vadd.f32 %v1090_v30, %v3273_v35  ;;  %v1092_v43 = vpop.f32.mrb[7].mxu0  ;;  %v1163_v45 = vpop.f32.mrb[7].mxu1  ;;  %v2704_v59 = vadd.f32 %v1161_v31, %v3282_v1 }
 0x469   :  { %v2689_v46 = vadd.f32 %v1092_v43, %v3275_v37  ;;  %v2705_v52 = vadd.f32 %v1163_v45, %v3279_v57 }
 0x46a   :  { %v2014_v49 = vmul.f32 -1.442695, %v2688_v42 }
 0x46b   :  { %v2015_v51 = vmul.f32 -1.442695, %v2689_v46  ;;  %v2016_v55 = vmul.f32 -1.442695, %v2705_v52 }
 0x46c   :  { %2806 = vpow2.f32 %v2014_v49 }
 0x46d   :  { %2808 = vpow2.f32 %v2015_v51 }
 0x46e   :  { %2810 = vpow2.f32 %v2016_v55 }
 0x46f   :  { %2812 = vtanh.f32 %v2704_v59 }
 0x476   :  { %v2807_v61 = vpop.eup %2806 }
 0x477   :  { %v2809_v2 = vpop.eup %2808  ;;  %v1173_v5 = vadd.f32 1.0, %v2807_v61 }
 0x478   :  { %v1179_v7 = vadd.f32 1.0, %v2809_v2  ;;  %v2811_v8 = vpop.eup %2810 }
 0x479   :  { %2814 = vrcp.f32 %v1173_v5  ;;  %v2813_v11 = vpop.eup %2812  ;;  %v1186_v20 = vadd.f32 1.0, %v2811_v8 }
 0x47a   :  { %2816 = vrcp.f32 %v1179_v7 }
 0x47b   :  { %2818 = vrcp.f32 %v1186_v20 }
 0x483   :  { %v2815_v12 = vpop.eup %2814 }
 0x484   :  { %v2817_v15 = vpop.eup %2816  ;;  %v1190_v17 = vmul.f32 %v2815_v12, %v2813_v11 }
 0x485   :  { %v1189_v21 = vmul.f32 %v2817_v15, %v3369_v28  ;;  %v2819_v33 = vpop.eup %2818 }
 0x487   :  { %v3411_v24 = vadd.f32 %v1190_v17, %v1189_v21 }
 0x489   :  { %2820 = vtanh.f32 %v3411_v24 }
 0x493   :  { %v2821_v34 = vpop.eup %2820 }
 0x494   :  { %v1193_v39 = vmul.f32 %v2821_v34, %v2819_v33 }
 0x496   :  { %1264 = vmatmul.mubr.f32.vlgmr.msra.gmra.mrb[8].mxu0 %v1193_v39  ;;  %1335 = vmatmul.mubr.f32.vlgmr.msra.gmra.mrb[8].mxu1 %v1193_v39 }
 0x497   :  { %2469 = vmatpush1.bf16.msra.mxu0 %v3124_v47  ;;  %2501 = vmatpush1.bf16.msra.mxu1 %v3127_v50 }
 0x498   :  { %2471 = vmatprep.subr.bf16.mxu0 %v3130_v53  ;;  %2503 = vmatprep.subr.bf16.mxu1 %v3132_v56 }
 0x499   :  { %1438 = vmatprep.mubr.f32.mxu0 %v3012_v0  ;;  %1509 = vmatprep.mubr.f32.mxu1 %v3012_v0 }
 0x49b   :  { %2473 = vmatpush1.bf16.msra.mxu0 %v3135_v60  ;;  %2505 = vmatpush1.bf16.msra.mxu1 %v3139_v63 }
 0x49c   :  { %2475 = vmatprep.subr.bf16.mxu0 %v3143_v3  ;;  %2507 = vmatprep.subr.bf16.mxu1 %v3146_v6 }
 0x49f   :  { %2477 = vmatpush1.bf16.msra.mxu0 %v3149_v10  ;;  %2509 = vmatpush1.bf16.msra.mxu1 %v3153_v13 }
 0x4a0   :  { %2479 = vmatprep.subr.bf16.mxu0 %v3157_v16  ;;  %2511 = vmatprep.subr.bf16.mxu1 %v3160_v19 }
 0x4a3   :  { %2481 = vmatpush1.bf16.msra.mxu0 %v3163_v23  ;;  %2513 = vmatpush1.bf16.msra.mxu1 %v3167_v26 }
 0x4a4   :  { %2483 = vmatprep.subr.bf16.mxu0 %v3171_v29  ;;  %2515 = vmatprep.subr.bf16.mxu1 %v3174_v32 }
 0x4a7   :  { %2485 = vmatpush1.bf16.msra.mxu0 %v3177_v36  ;;  %2517 = vmatpush1.bf16.msra.mxu1 %v3181_v40 }
 0x4a8   :  { %2487 = vmatprep.subr.bf16.mxu0 %v3185_v44  ;;  %2519 = vmatprep.subr.bf16.mxu1 %v3188_v48 }
 0x4ab   :  { %2489 = vmatpush1.bf16.msra.mxu0 %v3191_v54  ;;  %2521 = vmatpush1.bf16.msra.mxu1 %v3195_v58 }
 0x4ac   :  { %2491 = vmatprep.subr.bf16.mxu0 %v3199_v62  ;;  %2523 = vmatprep.subr.bf16.mxu1 %v3202_v4 }
 0x4af   :  { %2493 = vmatpush1.bf16.msra.mxu0 %v3205_v9  ;;  %2525 = vmatpush1.bf16.msra.mxu1 %v3209_v14 }
 0x4b0   :  { %2495 = vmatprep.subr.bf16.mxu0 %v3213_v18  ;;  %2527 = vmatprep.subr.bf16.mxu1 %v3216_v22 }
 0x4b3   :  { %2497 = vmatpush1.bf16.msra.mxu0 %v3219_v25  ;;  %2529 = vmatpush1.bf16.msra.mxu1 %v3223_v27 }
 0x4b4   :  { %2531 = vmatprep.subr.bf16.mxu0 %v3120_v38  ;;  %2563 = vmatprep.subr.bf16.mxu1 %v3122_v41 }
 0x569   :  { %v1265_v28 = vpop.f32.mrb[8].mxu0  ;;  %v1336_v30 = vpop.f32.mrb[8].mxu1 }
 0x56a   :  { %v2690_v31 = vadd.f32 %v1265_v28, %v3273_v35  ;;  %v1267_v42 = vpop.f32.mrb[9].mxu0  ;;  %v1338_v43 = vpop.f32.mrb[9].mxu1  ;;  %v2706_v55 = vadd.f32 %v1336_v30, %v3282_v1 }
 0x56b   :  { %v2691_v45 = vadd.f32 %v1267_v42, %v3275_v37  ;;  %v2707_v51 = vadd.f32 %v1338_v43, %v3279_v57 }
 0x56c   :  { %v2017_v46 = vmul.f32 -1.442695, %v2690_v31 }
 0x56d   :  { %v2018_v49 = vmul.f32 -1.442695, %v2691_v45  ;;  %v2019_v52 = vmul.f32 -1.442695, %v2707_v51 }
 0x56e   :  { %2822 = vpow2.f32 %v2017_v46 }
 0x56f   :  { %2824 = vpow2.f32 %v2018_v49 }
 0x570   :  { %2826 = vpow2.f32 %v2019_v52 }
 0x571   :  { %2828 = vtanh.f32 %v2706_v55 }
 0x578   :  { %v2823_v59 = vpop.eup %2822 }
 0x579   :  { %v2825_v61 = vpop.eup %2824  ;;  %v1348_v2 = vadd.f32 1.0, %v2823_v59 }
 0x57a   :  { %v1354_v5 = vadd.f32 1.0, %v2825_v61  ;;  %v2827_v7 = vpop.eup %2826 }
 0x57b   :  { %2830 = vrcp.f32 %v1348_v2  ;;  %v2829_v8 = vpop.eup %2828  ;;  %v1361_v17 = vadd.f32 1.0, %v2827_v7 }
 0x57c   :  { %2832 = vrcp.f32 %v1354_v5 }
 0x57d   :  { %2834 = vrcp.f32 %v1361_v17 }
 0x585   :  { %v2831_v11 = vpop.eup %2830 }
 0x586   :  { %v2833_v12 = vpop.eup %2832  ;;  %v1365_v15 = vmul.f32 %v2831_v11, %v2829_v8 }
 0x587   :  { %v1364_v20 = vmul.f32 %v2833_v12, %v3411_v24  ;;  %v2835_v33 = vpop.eup %2834 }
 0x589   :  { %v3453_v21 = vadd.f32 %v1365_v15, %v1364_v20 }
 0x58b   :  { %2836 = vtanh.f32 %v3453_v21 }
 0x595   :  { %v2837_v34 = vpop.eup %2836 }
 0x596   :  { %v1368_v39 = vmul.f32 %v2837_v34, %v2835_v33  ;;  %v1897_v34 = vld [vmem:[#allocation9 + $0x18] sm:$0xff] }
 0x598   :  { %1439 = vmatmul.mubr.f32.vlgmr.msra.gmra.mrb[10].mxu0 %v1368_v39  ;;  %1510 = vmatmul.mubr.f32.vlgmr.msra.gmra.mrb[10].mxu1 %v1368_v39 }
 0x599   :  { %2533 = vmatpush1.bf16.msra.mxu0 %v3124_v47  ;;  %2565 = vmatpush1.bf16.msra.mxu1 %v3127_v50 }
 0x59a   :  { %2535 = vmatprep.subr.bf16.mxu0 %v3130_v53  ;;  %2567 = vmatprep.subr.bf16.mxu1 %v3132_v56 }
 0x59b   :  { %1613 = vmatprep.mubr.f32.mxu0 %v3012_v0  ;;  %1684 = vmatprep.mubr.f32.mxu1 %v3012_v0 }
 0x59d   :  { %2537 = vmatpush1.bf16.msra.mxu0 %v3135_v60  ;;  %2569 = vmatpush1.bf16.msra.mxu1 %v3139_v63 }
 0x59e   :  { %2539 = vmatprep.subr.bf16.mxu0 %v3143_v3  ;;  %2571 = vmatprep.subr.bf16.mxu1 %v3146_v6 }
 0x5a1   :  { %2541 = vmatpush1.bf16.msra.mxu0 %v3149_v10  ;;  %2573 = vmatpush1.bf16.msra.mxu1 %v3153_v13 }
 0x5a2   :  { %2543 = vmatprep.subr.bf16.mxu0 %v3157_v16  ;;  %2575 = vmatprep.subr.bf16.mxu1 %v3160_v19 }
 0x5a5   :  { %2545 = vmatpush1.bf16.msra.mxu0 %v3163_v23  ;;  %2577 = vmatpush1.bf16.msra.mxu1 %v3167_v26 }
 0x5a6   :  { %2547 = vmatprep.subr.bf16.mxu0 %v3171_v29  ;;  %2579 = vmatprep.subr.bf16.mxu1 %v3174_v32 }
 0x5a9   :  { %2549 = vmatpush1.bf16.msra.mxu0 %v3177_v36  ;;  %2581 = vmatpush1.bf16.msra.mxu1 %v3181_v40 }
 0x5aa   :  { %2551 = vmatprep.subr.bf16.mxu0 %v3185_v44  ;;  %2583 = vmatprep.subr.bf16.mxu1 %v3188_v48 }
 0x5ad   :  { %2553 = vmatpush1.bf16.msra.mxu0 %v3191_v54  ;;  %2585 = vmatpush1.bf16.msra.mxu1 %v3195_v58 }
 0x5ae   :  { %2555 = vmatprep.subr.bf16.mxu0 %v3199_v62  ;;  %2587 = vmatprep.subr.bf16.mxu1 %v3202_v4 }
 0x5b1   :  { %2557 = vmatpush1.bf16.msra.mxu0 %v3205_v9  ;;  %2589 = vmatpush1.bf16.msra.mxu1 %v3209_v14 }
 0x5b2   :  { %2559 = vmatprep.subr.bf16.mxu0 %v3213_v18  ;;  %2591 = vmatprep.subr.bf16.mxu1 %v3216_v22 }
 0x5b5   :  { %2561 = vmatpush1.bf16.msra.mxu0 %v3219_v25  ;;  %2593 = vmatpush1.bf16.msra.mxu1 %v3223_v27 }
 0x5b6   :  { %2595 = vmatprep.subr.bf16.mxu0 %v3120_v38  ;;  %2627 = vmatprep.subr.bf16.mxu1 %v3122_v41 }
 0x66b   :  { %v1440_v24 = vpop.f32.mrb[10].mxu0  ;;  %v1511_v28 = vpop.f32.mrb[10].mxu1 }
 0x66c   :  { %v2692_v30 = vadd.f32 %v1440_v24, %v3273_v35  ;;  %v1442_v31 = vpop.f32.mrb[11].mxu0  ;;  %v1513_v42 = vpop.f32.mrb[11].mxu1  ;;  %v2708_v52 = vadd.f32 %v1511_v28, %v3282_v1  ;;  %v1898_v24 = vld [vmem:[#allocation9 + $0x20] sm:$0xff]  ;;  %v1899_v28 = vld [vmem:[#allocation9 + $0x28] sm:$0xff] }
 0x66d   :  { %v2693_v43 = vadd.f32 %v1442_v31, %v3275_v37  ;;  %v2709_v49 = vadd.f32 %v1513_v42, %v3279_v57  ;;  %v1900_v31 = vld [vmem:[#allocation9 + $0x30] sm:$0xff]  ;;  %v1901_v42 = vld [vmem:[#allocation9 + $0x38] sm:$0xff] }
 0x66e   :  { %v2020_v45 = vmul.f32 -1.442695, %v2692_v30  ;;  %v2665_v30 = vpack.c.bf16 %v1899_v28, %v1898_v24 }
 0x66f   :  { %v2021_v46 = vmul.f32 -1.442695, %v2693_v43  ;;  %v2022_v51 = vmul.f32 -1.442695, %v2709_v49  ;;  %v2668_v43 = vpack.c.bf16 %v1901_v42, %v1900_v31 }
 0x670   :  { %2838 = vpow2.f32 %v2020_v45  ;;  %v1902_v45 = vld [vmem:[#allocation9 + $0x40] sm:$0xff] }
 0x671   :  { %2840 = vpow2.f32 %v2021_v46  ;;  %v1903_v46 = vld [vmem:[#allocation9 + $0x48] sm:$0xff] }
 0x672   :  { %2842 = vpow2.f32 %v2022_v51  ;;  %v2671_v49 = vpack.c.bf16 %v1903_v46, %v1902_v45  ;;  %v1904_v51 = vld [vmem:[#allocation9 + $0x50] sm:$0xff] }
 0x673   :  { %2844 = vtanh.f32 %v2708_v52  ;;  %v1905_v52 = vld [vmem:[#allocation9 + $0x58] sm:$0xff] }
 0x67a   :  { %v2839_v38 = vpop.eup %2838 }
 0x67b   :  { %v2841_v55 = vpop.eup %2840  ;;  %v1523_v41 = vadd.f32 1.0, %v2839_v38  ;;  %v1906_v38 = vld [vmem:[#allocation9 + $0x60] sm:$0xff] }
 0x67c   :  { %v1529_v59 = vadd.f32 1.0, %v2841_v55  ;;  %v2843_v61 = vpop.eup %2842  ;;  %v2674_v55 = vpack.c.bf16 %v1905_v52, %v1904_v51 }
 0x67d   :  { %2846 = vrcp.f32 %v1523_v41  ;;  %v2845_v2 = vpop.eup %2844  ;;  %v1536_v11 = vadd.f32 1.0, %v2843_v61  ;;  %v1907_v41 = vld [vmem:[#allocation9 + $0x68] sm:$0xff]  ;;  %v1908_v61 = vld [vmem:[#allocation9 + $0x70] sm:$0xff] }
 0x67e   :  { %2848 = vrcp.f32 %v1529_v59  ;;  %v2677_v59 = vpack.c.bf16 %v1907_v41, %v1906_v38 }
 0x67f   :  { %2850 = vrcp.f32 %v1536_v11 }
 0x687   :  { %v2847_v5 = vpop.eup %2846 }
 0x688   :  { %v2849_v7 = vpop.eup %2848  ;;  %v1540_v8 = vmul.f32 %v2847_v5, %v2845_v2  ;;  %v1909_v2 = vld [vmem:[#allocation9 + $0x78] sm:$0xff] }
 0x689   :  { %v1539_v12 = vmul.f32 %v2849_v7, %v3453_v21  ;;  %v2851_v17 = vpop.eup %2850  ;;  %v1896_v21 = vld [vmem:[#allocation9 + $0x10] sm:$0xff]  ;;  %v2680_v5 = vpack.c.bf16 %v1909_v2, %v1908_v61 }
 0x68a   :  { %v2662_v39 = vpack.c.bf16 %v1897_v34, %v1896_v21 }
 0x68b   :  { %v3495_v15 = vadd.f32 %v1540_v8, %v1539_v12 }
 0x68d   :  { %2852 = vtanh.f32 %v3495_v15 }
 0x697   :  { %v2853_v20 = vpop.eup %2852 }
 0x698   :  { %v1543_v33 = vmul.f32 %v2853_v20, %v2851_v17 }
 0x69a   :  { %1614 = vmatmul.mubr.f32.vlgmr.msra.gmra.mrb[12].mxu0 %v1543_v33  ;;  %1685 = vmatmul.mubr.f32.vlgmr.msra.gmra.mrb[12].mxu1 %v1543_v33 }
 0x69b   :  { %2597 = vmatpush1.bf16.msra.mxu0 %v3124_v47  ;;  %2629 = vmatpush1.bf16.msra.mxu1 %v3127_v50 }
 0x69c   :  { %2599 = vmatprep.subr.bf16.mxu0 %v3130_v53  ;;  %2631 = vmatprep.subr.bf16.mxu1 %v3132_v56 }
 0x69d   :  { %1788 = vmatprep.mubr.f32.mxu0 %v3012_v0  ;;  %1859 = vmatprep.mubr.f32.mxu1 %v3012_v0 }
 0x69f   :  { %2601 = vmatpush1.bf16.msra.mxu0 %v3135_v60  ;;  %2633 = vmatpush1.bf16.msra.mxu1 %v3139_v63 }
 0x6a0   :  { %2603 = vmatprep.subr.bf16.mxu0 %v3143_v3  ;;  %2635 = vmatprep.subr.bf16.mxu1 %v3146_v6 }
 0x6a3   :  { %2605 = vmatpush1.bf16.msra.mxu0 %v3149_v10  ;;  %2637 = vmatpush1.bf16.msra.mxu1 %v3153_v13 }
 0x6a4   :  { %2607 = vmatprep.subr.bf16.mxu0 %v3157_v16  ;;  %2639 = vmatprep.subr.bf16.mxu1 %v3160_v19 }
 0x6a7   :  { %2609 = vmatpush1.bf16.msra.mxu0 %v3163_v23  ;;  %2641 = vmatpush1.bf16.msra.mxu1 %v3167_v26 }
 0x6a8   :  { %2611 = vmatprep.subr.bf16.mxu0 %v3171_v29  ;;  %2643 = vmatprep.subr.bf16.mxu1 %v3174_v32 }
 0x6ab   :  { %2613 = vmatpush1.bf16.msra.mxu0 %v3177_v36  ;;  %2645 = vmatpush1.bf16.msra.mxu1 %v3181_v40 }
 0x6ac   :  { %2615 = vmatprep.subr.bf16.mxu0 %v3185_v44  ;;  %2647 = vmatprep.subr.bf16.mxu1 %v3188_v48 }
 0x6af   :  { %2617 = vmatpush1.bf16.msra.mxu0 %v3191_v54  ;;  %2649 = vmatpush1.bf16.msra.mxu1 %v3195_v58 }
 0x6b0   :  { %2619 = vmatprep.subr.bf16.mxu0 %v3199_v62  ;;  %2651 = vmatprep.subr.bf16.mxu1 %v3202_v4 }
 0x6b3   :  { %2621 = vmatpush1.bf16.msra.mxu0 %v3205_v9  ;;  %2653 = vmatpush1.bf16.msra.mxu1 %v3209_v14 }
 0x6b4   :  { %2623 = vmatprep.subr.bf16.mxu0 %v3213_v18  ;;  %2655 = vmatprep.subr.bf16.mxu1 %v3216_v22  ;;  %v1894_v18 = vld [vmem:[#allocation9] sm:$0xff]  ;;  %v1895_v22 = vld [vmem:[#allocation9 + $0x8] sm:$0xff] }
 0x6b7   :  { %2625 = vmatpush1.bf16.msra.mxu0 %v3219_v25  ;;  %2657 = vmatpush1.bf16.msra.mxu1 %v3223_v27  ;;  %v2659_v25 = vpack.c.bf16 %v1895_v22, %v1894_v18  ;;  %v3013_v27 = vmov 0.0|0.0  }
 0x6b8   :  { %2658 = vmatprep.subr.bf16.mxu0 %v3013_v27 }
 0x76d   :  { %v1615_v47 = vpop.f32.mrb[12].mxu0  ;;  %v1686_v50 = vpop.f32.mrb[12].mxu1 }
 0x76e   :  { %v2694_v53 = vadd.f32 %v1615_v47, %v3273_v35  ;;  %v1617_v56 = vpop.f32.mrb[13].mxu0  ;;  %v1688_v60 = vpop.f32.mrb[13].mxu1  ;;  %v2710_v16 = vadd.f32 %v1686_v50, %v3282_v1 }
 0x76f   :  { %v2695_v63 = vadd.f32 %v1617_v56, %v3275_v37  ;;  %v2711_v10 = vadd.f32 %v1688_v60, %v3279_v57 }
 0x770   :  { %v2023_v3 = vmul.f32 -1.442695, %v2694_v53 }
 0x771   :  { %v2024_v6 = vmul.f32 -1.442695, %v2695_v63  ;;  %v2025_v13 = vmul.f32 -1.442695, %v2711_v10 }
 0x772   :  { %2854 = vpow2.f32 %v2023_v3 }
 0x773   :  { %2856 = vpow2.f32 %v2024_v6 }
 0x774   :  { %2858 = vpow2.f32 %v2025_v13 }
 0x775   :  { %2860 = vtanh.f32 %v2710_v16 }
 0x77c   :  { %v2855_v19 = vpop.eup %2854 }
 0x77d   :  { %v2857_v23 = vpop.eup %2856  ;;  %v1698_v26 = vadd.f32 1.0, %v2855_v19 }
 0x77e   :  { %v1704_v29 = vadd.f32 1.0, %v2857_v23  ;;  %v2859_v32 = vpop.eup %2858 }
 0x77f   :  { %2862 = vrcp.f32 %v1698_v26  ;;  %v2861_v36 = vpop.eup %2860  ;;  %v1711_v54 = vadd.f32 1.0, %v2859_v32  ;;  %v2029_v26 = vld [vmem:[%s3564_s5] ss:$0 sm:$0xff] }
 0x780   :  { %2864 = vrcp.f32 %v1704_v29 }
 0x781   :  { %2866 = vrcp.f32 %v1711_v54 }
 0x789   :  { %v2863_v40 = vpop.eup %2862 }
 0x78a   :  { %v2865_v44 = vpop.eup %2864  ;;  %v1715_v48 = vmul.f32 %v2863_v40, %v2861_v36 }
 0x78b   :  { %v1714_v58 = vmul.f32 %v2865_v44, %v3495_v15  ;;  %v2867_v4 = vpop.eup %2866 }
 0x78d   :  { %v3535_v62 = vadd.f32 %v1715_v48, %v1714_v58 }
 0x78f   :  { %2868 = vtanh.f32 %v3535_v62 }
 0x799   :  { %v2869_v9 = vpop.eup %2868 }
 0x79a   :  { %v1718_v14 = vmul.f32 %v2869_v9, %v2867_v4 }
 0x79c   :  { %1789 = vmatmul.mubr.f32.vlgmr.msra.gmra.mrb[14].mxu0 %v1718_v14  ;;  %1860 = vmatmul.mubr.f32.vlgmr.msra.gmra.mrb[14].mxu1 %v1718_v14 }
 0x79d   :  { %2660 = vmatpush3.bf16.msra.mxu0 %v2659_v25  ;;  %2079 = vmatprep.mubr.msk.f32.mxu0 %vm3014_vm0, %v3012_v0 }
 0x79e   :  { %2661 = vmatprep.subr.bf16.mxu0 %v3013_v27 }
 0x7a1   :  { %2663 = vmatpush3.bf16.msra.mxu0 %v2662_v39 }
 0x7a2   :  { %2664 = vmatprep.subr.bf16.mxu0 %v3013_v27 }
 0x7a5   :  { %2666 = vmatpush3.bf16.msra.mxu0 %v2665_v30 }
 0x7a6   :  { %2667 = vmatprep.subr.bf16.mxu0 %v3013_v27 }
 0x7a9   :  { %2669 = vmatpush3.bf16.msra.mxu0 %v2668_v43 }
 0x7aa   :  { %2670 = vmatprep.subr.bf16.mxu0 %v3013_v27 }
 0x7ad   :  { %2672 = vmatpush3.bf16.msra.mxu0 %v2671_v49 }
 0x7ae   :  { %2673 = vmatprep.subr.bf16.mxu0 %v3013_v27 }
 0x7b1   :  { %2675 = vmatpush3.bf16.msra.mxu0 %v2674_v55 }
 0x7b2   :  { %2676 = vmatprep.subr.bf16.mxu0 %v3013_v27 }
 0x7b5   :  { %2678 = vmatpush3.bf16.msra.mxu0 %v2677_v59 }
 0x7b6   :  { %2679 = vmatprep.subr.bf16.mxu0 %v3013_v27 }
 0x7b9   :  { %2681 = vmatpush3.bf16.msra.mxu0 %v2680_v5 }
 0x86f   :  { %v1790_v7 = vpop.f32.mrb[14].mxu0  ;;  %v1861_v8 = vpop.f32.mrb[14].mxu1 }
 0x870   :  { %v2696_v11 = vadd.f32 %v1790_v7, %v3273_v35  ;;  %v1792_v12 = vpop.f32.mrb[15].mxu0  ;;  %v1863_v15 = vpop.f32.mrb[15].mxu1  ;;  %v2712_v50 = vadd.f32 %v1861_v8, %v3282_v1 }
 0x871   :  { %v2697_v17 = vadd.f32 %v1792_v12, %v3275_v37  ;;  %v2713_v0 = vadd.f32 %v1863_v15, %v3279_v57 }
 0x872   :  { %v2026_v20 = vmul.f32 -1.442695, %v2696_v11 }
 0x873   :  { %v2027_v33 = vmul.f32 -1.442695, %v2697_v17  ;;  %v2028_v47 = vmul.f32 -1.442695, %v2713_v0 }
 0x874   :  { %2870 = vpow2.f32 %v2026_v20 }
 0x875   :  { %2872 = vpow2.f32 %v2027_v33 }
 0x876   :  { %2874 = vpow2.f32 %v2028_v47 }
 0x877   :  { %2876 = vtanh.f32 %v2712_v50 }
 0x87e   :  { %v2871_v53 = vpop.eup %2870 }
 0x87f   :  { %v2873_v56 = vpop.eup %2872  ;;  %v1873_v60 = vadd.f32 1.0, %v2871_v53 }
 0x880   :  { %v1879_v63 = vadd.f32 1.0, %v2873_v56  ;;  %v2875_v35 = vpop.eup %2874 }
 0x881   :  { %2878 = vrcp.f32 %v1873_v60  ;;  %v2877_v3 = vpop.eup %2876  ;;  %v1886_v13 = vadd.f32 1.0, %v2875_v35 }
 0x882   :  { %2880 = vrcp.f32 %v1879_v63 }
 0x883   :  { %2882 = vrcp.f32 %v1886_v13 }
 0x88b   :  { %v2879_v37 = vpop.eup %2878 }
 0x88c   :  { %v2881_v6 = vpop.eup %2880  ;;  %v1890_v10 = vmul.f32 %v2879_v37, %v2877_v3 }
 0x88d   :  { %v1889_v16 = vmul.f32 %v2881_v6, %v3535_v62  ;;  %v2883_v1 = vpop.eup %2882 }
 0x88f   :  { %v1891_v57 = vadd.f32 %v1890_v10, %v1889_v16 }
 0x891   :  { %2884 = vtanh.f32 %v1891_v57 }
 0x89b   :  { %v2885_v19 = vpop.eup %2884 }
 0x89c   :  { %v1893_v23 = vmul.f32 %v2885_v19, %v2883_v1 }
 0x89e   :  { %2080 = vmatmul.mubr.f32.vlgmr.msra.gmra.mrb[16].mxu0 %v1893_v23 }
 0x971   :  { %v1983_v29 = vpop.f32.mrb[16].mxu0 }
 0x972   :  { %v1984_v32 = vadd.f32 %v2029_v26, %v1983_v29  ;;  %v2081_v36 = vpop.f32.mrb[17].mxu0 }
 0x974   :  { %1987 = vst [vmem:[#allocation11] sm:$0xff] %v1984_v32 }
 0x975   :  { %2985 = shalt.err (!%p2982_p8)
}
 0x976   :  { %s2986_s28 = scalar_lea.hbm %s3565_s6, 128 }
 0x977   :  { %p2987_p9 = scmp.ne.s32.totalorder %s3565_s6, %s2986_s28  ;;  %p2990_p10 = scmp.lt.u32.totalorder %s2986_s28, %s3565_s6 }
 0x979   :  { %p2992_p11 = pnand %p2990_p10, %p2987_p9 }
 0x97b   :  { %2995 = shalt.err (!%p2992_p11)
}
 0x97c   :  { %1997 = dma.vmem_to_hbm [thread:$0]  %s1995_s24, 128, %s3565_s6, [#allocation5]  }
 0x97d   :  { %3002 = dma.done.wait [#allocation5], 128  }
 0x97e   :  { %3003 = vsyncadd [#allocation5], 4294967168 }
 0x97f   :  { %2001 = vsyncpa [#allocation4], 1 }
 0x980   :  { %2002 = vsyncpa [#allocation7], 1 }
 0x981   :  { %2003 = vsyncpa [#allocation10], 1 }
 0x982   :  { %2004 = vsyncpa [#allocation5], 1 }

</bundles_post_ra>
